<compile_context>
chip_gen: v6e
topology: v6e:2x2x1
jax: 0.10.0
libtpu: 0.0.40
codegen_flags: <defaults>
</compile_context>

<pallas_src>
from functools import partial

import numpy as np
import jax
import jax.numpy as jnp
from jax import lax
from jax.experimental import pallas as pl
from jax.experimental.pallas import tpu as pltpu


# ---------------- Pallas kernel ----------------
# w_ref  : (R, 2*Fp, hop)  blocked fused [real; imag] windowed DFT basis
#                          (constant index_map -> VMEM resident)
# cur_ref: (1, hop, TT)    hop-transposed input, current time tile
#                          cur[0, h, j] = x[(t0 + j) * hop + h]
# nxt_ref: (1, hop, NB)    first NB hop-blocks of the NEXT tile (window overlap)
# out_ref: (1, n_freq, TT) power spectrum tile, lane-dense along time
def _spectrogram_kernel(w_ref, cur_ref, nxt_ref, out_ref):
    n_r, two_fp, _hop = w_ref.shape
    tt = cur_ref.shape[2]
    fp = two_fp // 2

    # full strip of hop-blocks this tile's frames can touch: (hop, TT + NB)
    strip = jnp.concatenate([cur_ref[0], nxt_ref[0]], axis=1)

    # out[f, u] = sum_r sum_h W[r, f, h] * strip[h, u + r]
    acc = jnp.zeros((two_fp, tt), dtype=jnp.float32)
    for r in range(n_r):                                   # static unroll, R small
        acc = acc + jnp.dot(w_ref[r], strip[:, r:r + tt],
                            preferred_element_type=jnp.float32,
                            precision=lax.Precision.HIGHEST)

    real = acc[:fp, :]                                     # sublane-aligned split
    imag = acc[fp:, :]
    power = real * real + imag * imag                      # (Fp, TT)
    out_ref[0] = power[:out_ref.shape[1], :]               # store only n_freq rows


# ---------------- deterministic parameter construction ----------------
def make_blocked_stft_weights(n_fft, win_length, hop, f_pad, n_blocks):
    """Blocked fused DFT basis, shape (R, 2*f_pad, hop).

    w[r, f, h]        =  cos(2*pi*f*(r*hop+h)/n_fft) * window[r*hop+h]   (real)
    w[r, f_pad+f, h]  = -sin(2*pi*f*(r*hop+h)/n_fft) * window[r*hop+h]   (imag)
    with a periodic Hann window padded (centered) to n_fft, matching the
    PyTorch module (librosa get_window(..., fftbins=True) + pad_center).
    Columns beyond n_fft (when hop does not divide n_fft) are zero.
    """
    n = np.arange(win_length)
    win = 0.5 - 0.5 * np.cos(2.0 * np.pi * n / win_length)   # periodic Hann
    lpad = (n_fft - win_length) // 2
    window = np.zeros(n_fft, dtype=np.float64)
    window[lpad:lpad + win_length] = win

    n_freq = n_fft // 2 + 1
    ang = 2.0 * np.pi * np.outer(np.arange(n_freq), np.arange(n_fft)) / n_fft
    w_cat = np.zeros((2 * f_pad, n_blocks * hop), dtype=np.float64)
    w_cat[:n_freq, :n_fft] = np.cos(ang) * window[None, :]
    w_cat[f_pad:f_pad + n_freq, :n_fft] = -np.sin(ang) * window[None, :]
    w_blk = w_cat.reshape(2 * f_pad, n_blocks, hop).transpose(1, 0, 2)
    return jnp.asarray(w_blk, jnp.float32)


# ---------------- forward (glue around the kernel) ----------------
@partial(jax.jit, static_argnames=("n_fft", "hop_length", "win_length",
                                   "center", "pad_mode", "time_tile"))
def spectrogram_forward(x, *, n_fft, hop_length=None, win_length=None,
                        center=True, pad_mode="reflect", time_tile=1024):
    """x: (batch, in_chans, data_length) f32.
    Returns (batch, in_chans * (n_fft//2 + 1), n_frames) = real**2 + imag**2,
    matching the torch Spectrogram (power=2) / STFT-as-conv module."""
    if win_length is None:
        win_length = n_fft
    if hop_length is None:
        hop_length = win_length // 4
    hop = int(hop_length)

    B, C, L = x.shape
    n_freq = n_fft // 2 + 1
    f_pad = ((n_freq + 7) // 8) * 8               # sublane-aligned real/imag split
    n_blk = -(-n_fft // hop)                      # R = ceil(n_fft / hop)
    w_blk = make_blocked_stft_weights(n_fft, win_length, hop, f_pad, n_blk)

    # ---- center padding (reflect) -- still one XLA pass (see TODO at top).
    if center:
        p = n_fft // 2
        if pad_mode == "reflect":
            assert L > p, "reflect padding requires data_length > n_fft // 2"
            x = jnp.pad(x, ((0, 0), (0, 0), (p, p)), mode="reflect")
        else:
            x = jnp.pad(x, ((0, 0), (0, 0), (p, p)))
    Lp = x.shape[-1]
    n_frames = (Lp - n_fft) // hop + 1
    assert n_frames >= 1

    # ---- tiling: NB = overlap chunk (hop-blocks), TT = frames per tile.
    NB = max(128, ((n_blk - 1 + 127) // 128) * 128)
    TT = max(NB, (int(time_tile) // NB) * NB)

    def vmem_est(tt):           # per-step VMEM (dbl-buffered tiles + weights + temps)
        return (2 * 4 * (hop * tt + hop * NB + n_freq * tt)
                + 4 * int(w_blk.size)
                + 4 * (2 * f_pad * tt + hop * (tt + NB)))

    VMEM_BUDGET = 40 << 20      # sized for v7x (64 MiB physical); v5e/v6e have more
    while vmem_est(TT) > VMEM_BUDGET and TT > NB:
        TT = max(NB, (TT // 2 // NB) * NB)

    if n_frames >= TT:
        n_tt = -(-n_frames // TT)
        out_T = n_frames        # partial last block -> masked stores, no epilogue slice
    else:
        TT = -(-n_frames // NB) * NB
        n_tt = 1
        out_T = TT              # tiny input: pad lanes to >=128, slice once below

    # ---- hop-transposed input: x_t[bc, h, m] = x[bc, m*hop + h]  (one XLA pass)
    m_total = max(n_tt * TT + NB, -(-Lp // hop))
    need = m_total * hop
    x = jnp.pad(x, ((0, 0), (0, 0), (0, need - Lp)))
    x_t = jnp.swapaxes(x.reshape(B * C, m_total, hop), 1, 2)   # (BC, hop, M)

    two_fp = 2 * f_pad
    flops = int(B * C * n_tt * TT * (2 * two_fp * n_blk * hop + 3 * f_pad))
    bytes_acc = int(4 * (x_t.size + w_blk.size + B * C * n_freq * out_T))
    vmem_limit = int(min(max(32 << 20, 2 * vmem_est(TT)), 50 << 20))

    spec = pl.pallas_call(
        _spectrogram_kernel,
        out_shape=jax.ShapeDtypeStruct((B * C, n_freq, out_T), jnp.float32),
        grid=(B * C, n_tt),
        in_specs=[
            # weights: constant block index -> stays resident in VMEM
            pl.BlockSpec((n_blk, two_fp, hop), lambda bc, tt: (0, 0, 0)),
            # current tile of hop-blocks (non-overlapping)
            pl.BlockSpec((1, hop, TT), lambda bc, tt: (bc, 0, tt)),
            # first NB hop-blocks of the next tile (covers the window overlap)
            pl.BlockSpec((1, hop, NB), lambda bc, tt: (bc, 0, (tt + 1) * (TT // NB))),
        ],
        out_specs=pl.BlockSpec((1, n_freq, TT), lambda bc, tt: (bc, 0, tt)),
        compiler_params=pltpu.CompilerParams(
            dimension_semantics=("parallel", "parallel"),
            vmem_limit_bytes=vmem_limit),
        cost_estimate=pl.CostEstimate(flops=flops, transcendentals=0,
                                      bytes_accessed=bytes_acc),
    )(w_blk, x_t, x_t)

    spec = spec.reshape(B, C * n_freq, out_T)                 # free reshape
    if out_T != n_frames:                                     # only for tiny inputs
        spec = spec[..., :n_frames]
    return spec


# ---------------- independent float64 numpy reference ----------------
def _reference_np(x, n_fft, hop, win_length, center=True, pad_mode="reflect"):
    x = np.asarray(x, dtype=np.float64)
    n = np.arange(win_length)
    win = 0.5 - 0.5 * np.cos(2.0 * np.pi * n / win_length)
    lpad = (n_fft - win_length) // 2
    window = np.zeros(n_fft, dtype=np.float64)
    window[lpad:lpad + win_length] = win
    n_freq = n_fft // 2 + 1
    ang = 2.0 * np.pi * np.outer(np.arange(n_freq), np.arange(n_fft)) / n_fft
    wr = np.cos(ang) * window[None, :]
    wi = -np.sin(ang) * window[None, :]
    if center:
        p = n_fft // 2
        mode = "reflect" if pad_mode == "reflect" else "constant"
        x = np.pad(x, ((0, 0), (0, 0), (p, p)), mode=mode)
    B, C, Lp = x.shape
    T = (Lp - n_fft) // hop + 1
    idx = np.arange(T)[:, None] * hop + np.arange(n_fft)[None, :]   # (T, K)
    fr = x[:, :, idx]                                               # (B, C, T, K)
    real = np.einsum("bctk,fk->bcft", fr, wr)
    imag = np.einsum("bctk,fk->bcft", fr, wi)
    power = real ** 2 + imag ** 2
    return power.reshape(B, C * n_freq, T)


if __name__ == "__main__":
    n_fft, win_length, hop_length = 64, 64, 16
    n_freq = n_fft // 2 + 1

    # --- test 1: tiny input -> single time tile (padded to 128 lanes, sliced back)
    B, C, L = 2, 2, 400
    x1 = jax.random.normal(jax.random.PRNGKey(0), (B, C, L), dtype=jnp.float32)
    out1 = jax.block_until_ready(spectrogram_forward(
        x1, n_fft=n_fft, hop_length=hop_length, win_length=win_length))
    ref1 = _reference_np(np.asarray(x1), n_fft, hop_length, win_length)
    assert out1.shape == ref1.shape == (B, C * n_freq, 26), (out1.shape, ref1.shape)
    np.testing.assert_allclose(np.asarray(out1), ref1, rtol=1e-4, atol=1e-3)

    # --- test 2: longer input -> multi-tile pipelined path + partial last tile
    L2 = 8192
    x2 = jax.random.normal(jax.random.PRNGKey(1), (B, C, L2), dtype=jnp.float32)
    out2 = jax.block_until_ready(spectrogram_forward(
        x2, n_fft=n_fft, hop_length=hop_length, win_length=win_length,
        time_tile=256))
    ref2 = _reference_np(np.asarray(x2), n_fft, hop_length, win_length)
    assert out2.shape == ref2.shape == (B, C * n_freq, 513), (out2.shape, ref2.shape)
    np.testing.assert_allclose(np.asarray(out2), ref2, rtol=1e-4, atol=1e-3)

    print("KERNEL_OK")
</pallas_src>

<mosaic_0001>
module attributes {stable_mosaic.version = 11 : i64} {
  func.func @_spectrogram_kernel(%arg0: i32, %arg1: i32, %arg2: memref<4x80x16xf32, #tpu.memory_space<vmem>>, %arg3: memref<1x16x128xf32, #tpu.memory_space<vmem>>, %arg4: memref<1x16x128xf32, #tpu.memory_space<vmem>>, %arg5: memref<1x33x128xf32, #tpu.memory_space<vmem>>) attributes {dimension_semantics = [#tpu.dimension_semantics<parallel>, #tpu.dimension_semantics<parallel>], iteration_bounds = array<i64: 4, 1>, scalar_prefetch = 0 : i64, scratch_operands = 0 : i64, tpu.core_type = #tpu.core_type<tc>, window_params = [{pipeline_mode = #tpu.pipeline_mode<synchronous>, transform_indices = @transform_0, window_bounds = array<i64: 4, 80, 16>}, {transform_indices = @transform_1, window_bounds = array<i64: 1, 16, 128>}, {transform_indices = @transform_2, window_bounds = array<i64: 1, 16, 128>}, {transform_indices = @transform_3, window_bounds = array<i64: 1, 33, 128>}]} {
    %c0 = arith.constant 0 : index
    %c0_0 = arith.constant 0 : index
    %c0_1 = arith.constant 0 : index
    %0 = vector.load %arg3[%c0, %c0_0, %c0_1] : memref<1x16x128xf32, #tpu.memory_space<vmem>>, vector<1x16x128xf32>
    %1 = vector.shape_cast %0 : vector<1x16x128xf32> to vector<16x128xf32>
    %c0_2 = arith.constant 0 : index
    %c0_3 = arith.constant 0 : index
    %c0_4 = arith.constant 0 : index
    %2 = vector.load %arg4[%c0_2, %c0_3, %c0_4] : memref<1x16x128xf32, #tpu.memory_space<vmem>>, vector<1x16x128xf32>
    %3 = vector.shape_cast %2 : vector<1x16x128xf32> to vector<16x128xf32>
    %4 = tpu.concatenate %1, %3 in 1 : vector<16x128xf32>, vector<16x128xf32> -> vector<16x256xf32>
    %cst = arith.constant 0.000000e+00 : f32
    %5 = vector.broadcast %cst : f32 to vector<80x128xf32>
    %c0_5 = arith.constant 0 : index
    %c0_6 = arith.constant 0 : index
    %c0_7 = arith.constant 0 : index
    %6 = vector.load %arg2[%c0_5, %c0_6, %c0_7] : memref<4x80x16xf32, #tpu.memory_space<vmem>>, vector<1x80x16xf32>
    %7 = vector.shape_cast %6 : vector<1x80x16xf32> to vector<80x16xf32>
    %8 = vector.extract_strided_slice %4 {offsets = [0, 0], sizes = [16, 128], strides = [1, 1]} : vector<16x256xf32> to vector<16x128xf32>
    %cst_8 = arith.constant dense<0.000000e+00> : vector<80x128xf32>
    %9 = tpu.matmul %7, %8, %cst_8 {dimension_numbers = #tpu.dot_dimension_numbers<[1], [0], [0], [1], [0, 0, 1, 1], [], []>, precision = #tpu.contract_precision<fp32>} : vector<80x16xf32>, vector<16x128xf32>, vector<80x128xf32> -> vector<80x128xf32>
    %10 = arith.addf %5, %9 : vector<80x128xf32>
    %c1 = arith.constant 1 : index
    %c0_9 = arith.constant 0 : index
    %c0_10 = arith.constant 0 : index
    %11 = vector.load %arg2[%c1, %c0_9, %c0_10] : memref<4x80x16xf32, #tpu.memory_space<vmem>>, vector<1x80x16xf32>
    %12 = vector.shape_cast %11 : vector<1x80x16xf32> to vector<80x16xf32>
    %13 = vector.extract_strided_slice %4 {offsets = [0, 1], sizes = [16, 128], strides = [1, 1]} : vector<16x256xf32> to vector<16x128xf32>
    %cst_11 = arith.constant dense<0.000000e+00> : vector<80x128xf32>
    %14 = tpu.matmul %12, %13, %cst_11 {dimension_numbers = #tpu.dot_dimension_numbers<[1], [0], [0], [1], [0, 0, 1, 1], [], []>, precision = #tpu.contract_precision<fp32>} : vector<80x16xf32>, vector<16x128xf32>, vector<80x128xf32> -> vector<80x128xf32>
    %15 = arith.addf %10, %14 : vector<80x128xf32>
    %c2 = arith.constant 2 : index
    %c0_12 = arith.constant 0 : index
    %c0_13 = arith.constant 0 : index
    %16 = vector.load %arg2[%c2, %c0_12, %c0_13] : memref<4x80x16xf32, #tpu.memory_space<vmem>>, vector<1x80x16xf32>
    %17 = vector.shape_cast %16 : vector<1x80x16xf32> to vector<80x16xf32>
    %18 = vector.extract_strided_slice %4 {offsets = [0, 2], sizes = [16, 128], strides = [1, 1]} : vector<16x256xf32> to vector<16x128xf32>
    %cst_14 = arith.constant dense<0.000000e+00> : vector<80x128xf32>
    %19 = tpu.matmul %17, %18, %cst_14 {dimension_numbers = #tpu.dot_dimension_numbers<[1], [0], [0], [1], [0, 0, 1, 1], [], []>, precision = #tpu.contract_precision<fp32>} : vector<80x16xf32>, vector<16x128xf32>, vector<80x128xf32> -> vector<80x128xf32>
    %20 = arith.addf %15, %19 : vector<80x128xf32>
    %c3 = arith.constant 3 : index
    %c0_15 = arith.constant 0 : index
    %c0_16 = arith.constant 0 : index
    %21 = vector.load %arg2[%c3, %c0_15, %c0_16] : memref<4x80x16xf32, #tpu.memory_space<vmem>>, vector<1x80x16xf32>
    %22 = vector.shape_cast %21 : vector<1x80x16xf32> to vector<80x16xf32>
    %23 = vector.extract_strided_slice %4 {offsets = [0, 3], sizes = [16, 128], strides = [1, 1]} : vector<16x256xf32> to vector<16x128xf32>
    %cst_17 = arith.constant dense<0.000000e+00> : vector<80x128xf32>
    %24 = tpu.matmul %22, %23, %cst_17 {dimension_numbers = #tpu.dot_dimension_numbers<[1], [0], [0], [1], [0, 0, 1, 1], [], []>, precision = #tpu.contract_precision<fp32>} : vector<80x16xf32>, vector<16x128xf32>, vector<80x128xf32> -> vector<80x128xf32>
    %25 = arith.addf %20, %24 : vector<80x128xf32>
    %26 = vector.extract_strided_slice %25 {offsets = [0, 0], sizes = [40, 128], strides = [1, 1]} : vector<80x128xf32> to vector<40x128xf32>
    %27 = vector.extract_strided_slice %25 {offsets = [40, 0], sizes = [40, 128], strides = [1, 1]} : vector<80x128xf32> to vector<40x128xf32>
    %28 = arith.mulf %26, %26 : vector<40x128xf32>
    %29 = arith.mulf %27, %27 : vector<40x128xf32>
    %30 = arith.addf %28, %29 : vector<40x128xf32>
    %31 = vector.extract_strided_slice %30 {offsets = [0, 0], sizes = [33, 128], strides = [1, 1]} : vector<40x128xf32> to vector<33x128xf32>
    %c0_18 = arith.constant 0 : index
    %c0_19 = arith.constant 0 : index
    %c0_20 = arith.constant 0 : index
    %32 = vector.load %arg5[%c0_18, %c0_19, %c0_20] : memref<1x33x128xf32, #tpu.memory_space<vmem>>, vector<1x33x128xf32>
    %33 = vector.shape_cast %32 : vector<1x33x128xf32> to vector<33x128xf32>
    %34 = vector.shape_cast %31 : vector<33x128xf32> to vector<1x33x128xf32>
    tpu.vector_store %arg5[%c0_18, %c0_19, %c0_20], %34 {strides = array<i32>} : memref<1x33x128xf32, #tpu.memory_space<vmem>>, vector<1x33x128xf32>,
    return
  }
  func.func @transform_0(%arg0: i32, %arg1: i32) -> (i32, i32, i32) {
    %c0_i32 = arith.constant 0 : i32
    %c0_i32_0 = arith.constant 0 : i32
    %c0_i32_1 = arith.constant 0 : i32
    %c0_i32_2 = arith.constant 0 : i32
    return %c0_i32, %c0_i32_0, %c0_i32_1 : i32, i32, i32
  }
  func.func @transform_1(%arg0: i32, %arg1: i32) -> (i32, i32, i32) {
    %c0_i32 = arith.constant 0 : i32
    %c0_i32_0 = arith.constant 0 : i32
    return %arg0, %c0_i32, %arg1 : i32, i32, i32
  }
  func.func @transform_2(%arg0: i32, %arg1: i32) -> (i32, i32, i32) {
    %c1_i32 = arith.constant 1 : i32
    %0 = arith.addi %arg1, %c1_i32 : i32
    %c1_i32_0 = arith.constant 1 : i32
    %1 = arith.muli %0, %c1_i32_0 : i32
    %c0_i32 = arith.constant 0 : i32
    %c0_i32_1 = arith.constant 0 : i32
    return %arg0, %c0_i32, %1 : i32, i32, i32
  }
  func.func @transform_3(%arg0: i32, %arg1: i32) -> (i32, i32, i32) {
    %c0_i32 = arith.constant 0 : i32
    %c0_i32_0 = arith.constant 0 : i32
    return %arg0, %c0_i32, %arg1 : i32, i32, i32
  }
}

</mosaic_0001>

<bundles_post_ra>
// kernel: spectrogram_forward.1
= control target key start
LH: loop header
LB: loop body
LE: loop exit
PB: predicated region body
PF: predicated region fallthrough
CT: control target
= control target key end

     0   :  { %s4943_s12 = smov 0   ;;  %s4945_s13 = smov 0   ;;  %s6034_s0 = inlined_call_operand.vmem [shape: f32[4,80,16], index: 0, kind: input, shape index: {}]   ;;  %s6035_s1 = inlined_call_operand.vmem [shape: f32[4,16,256], index: 1, kind: input, shape index: {}, may-alias: {1,2}]   ;;  %s6036_s2 = inlined_call_operand.vmem [shape: f32[4,16,256], index: 2, kind: input, shape index: {}, may-alias: {1,2}]   ;;  %s6037_s3 = inlined_call_operand.vmem [shape: f32[4,33,128], index: 3, kind: output, shape index: {}]  }
   0x1   :  { %s4947_s14 = smov 0   ;;  %s4949_s15 = smov 0  }
   0x2   :  { %s4951_s16 = smov 0  }
   0x3 LB: > { %s25_s17 = sadd.s32 1, %s4914_s15  ;;  %p62_p1 = scmp.ne.s32.totalorder %s4906_s13, %s4902_s12  ;;  %s4918_s16 = sphi %s4951_s16, %s13_s16   ;;  %s4914_s15 = sphi %s4949_s15, %s6050_s15   ;;  %s4910_s14 = sphi %s4947_s14, %s6049_s14   ;;  %s4906_s13 = sphi %s4945_s13, %s6048_s13   ;;  %s4902_s12 = sphi %s4943_s12, %s6047_s12  }
   0x4   : > { %p27_p0 = scmp.ge.s32.totalorder %s25_s17, 4  ;;  %p63_p2 = scmp.eq.s32.totalorder %s4918_s16, 0 }
   0x5   : > { %s55_s20 = sadd.s32 1, %s4906_s13  ;;  %p4045_p5 = scmp.ge.s32.totalorder %s4918_s16, 4 }
   0x6   : > { %s6052_s17 = smov (%p27_p0, %s25_s17), 0  ;;  %p4974_p3 = por %p63_p2, %p62_p1 }
   0x7   : > { %s50_s19 = ssub.s32 %s4914_s15, %s6052_s17  ;;  %149 = sbr.rel (%p4045_p5) target bundleno = 22 (0x16), region = 20 }
   0x8   : > { %p53_p4 = scmp.eq.s32.totalorder %s50_s19, 0 }
   0xa   : > { %s4982_s21 = scalar_select %p53_p4, %s4906_s13, %s55_s20  }
   0xc   : > { %152 = sbr.rel (!%p4974_p3) target bundleno = 17 (0x11), region = 24  ;;  %s154_s22 = sand.u32 (%p4974_p3), 1, %s4906_s13  }
   0xd   : > { %s4090_s23 = sshll.u32 (%p4974_p3), %s4914_s15, 5  ;;  %s4046_s24 = sshll.u32 (%p4974_p3), %s154_s22, 4 }
   0xe   : > { %s160_s27 = scalar_lea.vmem (%p4974_p3), %s6035_s1, %s4090_s23  ;;  %s156_s28 = scalar_lea.vmem (%p4974_p3), [#allocation2], %s4046_s24 }
   0xf   : > { %v191_v0 = vld [vmem:[%s160_s27] sm:$0xff] (%p4974_p3)  ;;  %v193_v1 = vld [vmem:[%s160_s27 + $0x10] sm:$0xff] (%p4974_p3) }
  0x10   : > { %192 = vst [vmem:[%s156_s28] sm:$0xff] (%p4974_p3), %v191_v0  ;;  %194 = vst [vmem:[%s156_s28 + $0x8] sm:$0xff] (%p4974_p3), %v193_v1 }
  0x11 PF: > { %200 = sbr.rel (!%p4974_p3) target bundleno = 22 (0x16), region = 62  ;;  %s202_s29 = sand.u32 (%p4974_p3), 1, %s4906_s13  }
  0x12   : > { %s4091_s30 = sshll.u32 (%p4974_p3), %s4914_s15, 5  ;;  %s4049_s4 = sshll.u32 (%p4974_p3), %s202_s29, 4 }
  0x13   : > { %s3974_s7 = scalar_lea.vmem (%p4974_p3), %s6036_s2, %s4091_s30  ;;  %s204_s8 = scalar_lea.vmem (%p4974_p3), [#allocation3], %s4049_s4 }
  0x14   : > { %v4052_v2 = vld [vmem:[%s3974_s7 + $0x8] sm:$0xff] (%p4974_p3)  ;;  %v4053_v3 = vld [vmem:[%s3974_s7 + $0x18] sm:$0xff] (%p4974_p3) }
  0x15   : > { %241 = vst [vmem:[%s204_s8] sm:$0xff] (%p4974_p3), %v4052_v2  ;;  %243 = vst [vmem:[%s204_s8 + $0x8] sm:$0xff] (%p4974_p3), %v4053_v3 }
  0x16 PF: > { %p4054_p6 = scmp.ge.s32.totalorder %s4918_s16, 1  ;;  %p248_p7 = scmp.lt.s32.totalorder %s4918_s16, 5 }
  0x18   : > { %p249_p8 = pnand %p4054_p6, %p248_p7 }
  0x1a   : > { %252 = sbr.rel (%p249_p8) target bundleno = 610 (0x262), region = 100 }
  0x1f   : > { %s255_s9 = sand.u32 1, %s4902_s12   ;;  %v4058_v4 = vld [vmem:[%s6034_s0 + $0x50] sm:$0xff]  ;;  %vm343_vm0 = vcmask 130048   ;;  %s4920_s20 = smov 127   ;;  %v4059_v15 = vld [vmem:[%s6034_s0 + $0x58] sm:$0xff]  ;;  %v4060_v16 = vld [vmem:[%s6034_s0 + $0x60] sm:$0xff] }
  0x20   : > { %s4055_s18 = sshll.u32 %s255_s9, 4  ;;  %v345_v5 = vsel %vm343_vm0, %v4058_v4, 0  ;;  %s4921_s22 = smov 126   ;;  %v348_v17 = vsel %vm343_vm0, %v4059_v15, 0  ;;  %v351_v18 = vsel %vm343_vm0, %v4060_v16, 0  ;;  %v4061_v19 = vld [vmem:[%s6034_s0 + $0x68] sm:$0xff] }
  0x21   : > { %v5006_v6 = vand.u32 4294901760, %v345_v5  ;;  %s257_s19 = scalar_lea.vmem [#allocation2], %s4055_s18  ;;  %s264_s12 = scalar_lea.vmem [#allocation3], %s4055_s18  ;;  %v5037_v20 = vand.u32 4294901760, %v348_v17  ;;  %v5039_v21 = vand.u32 4294901760, %v351_v18  ;;  %v354_v22 = vsel %vm343_vm0, %v4061_v19, 0 }
  0x22   : > { %v5008_v7 = vld [vmem:[%s257_s19 + $0x8] sm:$0xff]  ;;  %v5010_v8 = vld [vmem:[%s257_s19] sm:$0xff]  ;;  %s4922_s23 = smov 125   ;;  %v5051_v26 = vand.u32 4294901760, %v354_v22  ;;  %vm338_vm1 = vcmask 1039360   ;;  %vm2115_vm2 = vcmask 1031168  }
  0x23   : > { %334 = vrot.lane.b32.xlu0 %v5008_v7, %s4920_s20  ;;  %330 = vrot.lane.b32.xlu1 %v5010_v8, %s4920_s20  ;;  %v5015_v9 = vsub.f32 %v345_v5, %v5006_v6  ;;  %v304_v10 = vld [vmem:[%s264_s12 + $0x8] sm:$0xff]  ;;  %v303_v11 = vld [vmem:[%s264_s12] sm:$0xff]  ;;  %v5049_v25 = vsub.f32 %v348_v17, %v5037_v20  ;;  %v5058_v29 = vsub.f32 %v351_v18, %v5039_v21  ;;  %vm3025_vm3 = vcmask 1022976   ;;  %p293_p9 = scmp.lt.s32.totalorder %s4910_s14, 3 }
  0x24   : > { %4403 = vmatprep.mubr.f32.mxu1 %v5006_v6  ;;  %v4062_v23 = vld [vmem:[%s6034_s0 + $0x70] sm:$0xff]  ;;  %v4063_v24 = vld [vmem:[%s6034_s0 + $0x78] sm:$0xff]  ;;  %v4064_v28 = vld [vmem:[%s6034_s0 + $0x80] sm:$0xff]  ;;  %v5069_v35 = vsub.f32 %v354_v22, %v5051_v26 }
  0x25   : > { %v443_v12 = vand.u32 4294901760, %v5015_v9  ;;  %v357_v27 = vsel %vm343_vm0, %v4062_v23, 0  ;;  %v360_v30 = vsel %vm343_vm0, %v4063_v24, 0  ;;  %v363_v32 = vsel %vm343_vm0, %v4064_v28, 0  ;;  %v4065_v33 = vld [vmem:[%s6034_s0 + $0x88] sm:$0xff]  ;;  %v4066_v40 = vld [vmem:[%s6034_s0 + $0x90] sm:$0xff] }
  0x26   : > { %v5061_v31 = vand.u32 4294901760, %v357_v27  ;;  %v453_v34 = vand.u32 4294901760, %v5049_v25  ;;  %v5071_v36 = vand.u32 4294901760, %v360_v30  ;;  %v463_v39 = vand.u32 4294901760, %v5058_v29  ;;  %v4067_v44 = vld [vmem:[%s6034_s0 + $0x98] sm:$0xff]  ;;  %s6054_s14 = smov (!%p293_p9, %s4910_s14), 3 }
  0x27   : > { %336 = vrot.lane.b32.xlu0 %v304_v10, %s4920_s20  ;;  %332 = vrot.lane.b32.xlu1 %v303_v11, %s4920_s20  ;;  %v444_v13 = vsub.f32 %v5015_v9, %v443_v12  ;;  %v5077_v41 = vand.u32 4294901760, %v363_v32  ;;  %v366_v42 = vsel %vm343_vm0, %v4065_v33, 0  ;;  %v473_v46 = vand.u32 4294901760, %v5069_v35  ;;  %s4836_s18 = smul.u32 40, %s6054_s14 }
  0x28   : > { %v5081_v43 = vsub.f32 %v357_v27, %v5061_v31  ;;  %v454_v45 = vsub.f32 %v5049_v25, %v453_v34  ;;  %v5091_v47 = vsub.f32 %v360_v30, %v5071_v36  ;;  %v369_v48 = vsel %vm343_vm0, %v4066_v40, 0 }
  0x29   : > { %v445_v14 = vand.u32 4294901760, %v444_v13  ;;  %v464_v51 = vsub.f32 %v5058_v29, %v463_v39  ;;  %v5097_v52 = vand.u32 4294901760, %v366_v42  ;;  %v5100_v55 = vsub.f32 %v363_v32, %v5077_v41  ;;  %s6006_s20 = scalar_lea.vmem %s6037_s3, %s4836_s18 }
  0x2a   : > { %v372_v56 = vsel %vm343_vm0, %v4067_v44, 0  ;;  %v483_v59 = vand.u32 4294901760, %v5081_v43  ;;  %v5108_v60 = vand.u32 4294901760, %v369_v48  ;;  %v455_v61 = vand.u32 4294901760, %v454_v45 }
  0x2b   : > { %2111 = vrot.lane.b32.xlu0 %v5008_v7, %s4921_s22  ;;  %2113 = vrot.lane.b32.xlu1 %v304_v10, %s4921_s22  ;;  %v474_v62 = vsub.f32 %v5069_v35, %v473_v46  ;;  %v493_v63 = vand.u32 4294901760, %v5091_v47  ;;  %v5118_v2 = vsub.f32 %v366_v42, %v5097_v52  ;;  %v5120_v3 = vand.u32 4294901760, %v372_v56 }
  0x2c   : > { %4384 = vmatprep.mubr.f32.mxu0 %v445_v14  ;;  %v465_v4 = vand.u32 4294901760, %v464_v51  ;;  %v503_v5 = vand.u32 4294901760, %v5100_v55  ;;  %v484_v13 = vsub.f32 %v5081_v43, %v483_v59  ;;  %v5129_v14 = vsub.f32 %v369_v48, %v5108_v60 }
  0x2d   : > { %v475_v15 = vand.u32 4294901760, %v474_v62  ;;  %v494_v16 = vsub.f32 %v5091_v47, %v493_v63  ;;  %v513_v19 = vand.u32 4294901760, %v5118_v2  ;;  %v5137_v22 = vsub.f32 %v372_v56, %v5120_v3 }
  0x2e   : > { %v504_v23 = vsub.f32 %v5100_v55, %v503_v5  ;;  %v485_v27 = vand.u32 4294901760, %v484_v13  ;;  %v523_v28 = vand.u32 4294901760, %v5129_v14  ;;  %v312_v13 = vld [vmem:[%s6034_s0 + $0x38] sm:$0xff] }
  0x2f   : > { %2107 = vrot.lane.b32.xlu0 %v5010_v8, %s4921_s22  ;;  %2109 = vrot.lane.b32.xlu1 %v303_v11, %s4921_s22  ;;  %v495_v32 = vand.u32 4294901760, %v494_v16  ;;  %v514_v33 = vsub.f32 %v5118_v2, %v513_v19 }
  0x30   : > { %v524_v40 = vsub.f32 %v5129_v14, %v523_v28 }
  0x31   : > { %v515_v42 = vand.u32 4294901760, %v514_v33 }
  0x32   : > { %v525_v45 = vand.u32 4294901760, %v524_v40 }
  0x33   : > { %3021 = vrot.lane.b32.xlu0 %v5008_v7, %s4922_s23  ;;  %3023 = vrot.lane.b32.xlu1 %v304_v10, %s4922_s23 }
  0x37   : > { %3017 = vrot.lane.b32.xlu0 %v5010_v8, %s4922_s23  ;;  %3019 = vrot.lane.b32.xlu1 %v303_v11, %s4922_s23 }
  0x95   : > { %v335_v37 = vpop.permute.xlu0 %334  ;;  %v331_v38 = vpop.permute.xlu1 %330 }
  0x99   : > { %v337_v49 = vpop.permute.xlu0 %336  ;;  %v333_v50 = vpop.permute.xlu1 %332 }
  0x9a   : > { %v340_v53 = vsel %vm338_vm1, %v335_v37, %v337_v49  ;;  %v339_v54 = vsel %vm338_vm1, %v331_v38, %v333_v50  ;;  %v533_v37 = vand.u32 4294901760, %v5137_v22  ;;  %v505_v38 = vand.u32 4294901760, %v504_v23 }
  0x9b   : > { %v5103_v57 = vand.u32 4294901760, %v340_v53  ;;  %v5105_v58 = vand.u32 4294901760, %v339_v54  ;;  %v5162_v49 = vand.u32 4294901760, %v5008_v7 }
  0x9c   : > { %v534_v44 = vsub.f32 %v5137_v22, %v533_v37 }
  0x9d   : > { %v571_v0 = vsub.f32 %v340_v53, %v5103_v57  ;;  %v578_v1 = vsub.f32 %v339_v54, %v5105_v58  ;;  %4380 = vmatprep.subr.mxu0 %v5103_v57  ;;  %v5169_v50 = vsub.f32 %v5008_v7, %v5162_v49  ;;  %v305_v53 = vld [vmem:[%s6034_s0] sm:$0xff] }
  0x9e   : > { %4381 = vmatpush3.msra.mxu0 %v5103_v57  ;;  %v535_v48 = vand.u32 4294901760, %v534_v44 }
  0x9f   : > { %4382 = vmatprep.subr.mxu0 %v5105_v58  ;;  %v572_v10 = vand.u32 4294901760, %v571_v0  ;;  %v579_v11 = vand.u32 4294901760, %v578_v1  ;;  %v5176_v51 = vand.u32 4294901760, %v5169_v50 }
  0xa0   : > { %4383 = vmatpush3.msra.mxu0 %v5105_v58 }
  0xa1   : > { %4385 = vmatmul.mubr.f32.vlgmr.msra.gmra.mxu0 %v455_v61  ;;  %4418 = vmatprep.subr.mxu0 %v571_v0  ;;  %v573_v17 = vsub.f32 %v571_v0, %v572_v10  ;;  %v580_v18 = vsub.f32 %v578_v1, %v579_v11  ;;  %v1449_v7 = vsub.f32 %v5169_v50, %v5176_v51  ;;  %v310_v61 = vld [vmem:[%s6034_s0 + $0x28] sm:$0xff] }
  0xa2   : > { %4419 = vmatpush3.msra.mxu0 %v571_v0  ;;  %4387 = vmatprep.mubr.f32.mxu0 %v465_v4 }
  0xa3   : > { %4420 = vmatprep.subr.mxu0 %v578_v1  ;;  %v574_v24 = vand.u32 4294901760, %v573_v17  ;;  %v581_v30 = vand.u32 4294901760, %v580_v18 }
  0xa4   : > { %4421 = vmatpush3.msra.mxu0 %v578_v1  ;;  %v311_v1 = vld [vmem:[%s6034_s0 + $0x30] sm:$0xff] }
  0xa5   : > { %4388 = vmatmul.mubr.f32.gmra.mxu0 %v475_v15  ;;  %4399 = vmatprep.subr.mxu1 %v574_v24 }
  0xa6   : > { %4456 = vmatprep.subr.mxu0 %v572_v10  ;;  %4400 = vmatpush3.msra.mxu1 %v574_v24  ;;  %v1242_v24 = vsel %vm343_vm0, %v312_v13, 0 }
  0xa7   : > { %4401 = vmatprep.subr.mxu1 %v581_v30  ;;  %4390 = vmatprep.mubr.f32.mxu0 %v485_v27 }
  0xa8   : > { %4402 = vmatpush3.msra.mxu1 %v581_v30 }
  0xa9   : > { %4391 = vmatmul.mubr.f32.gmra.mxu0 %v495_v32  ;;  %4404 = vmatmul.mubr.f32.vlgmr.msra.gmra.mxu1 %v5037_v20 }
  0xaa   : > { %4437 = vmatprep.subr.mxu1 %v5103_v57  ;;  %4393 = vmatprep.mubr.f32.mxu0 %v505_v38 }
  0xab   : > { %4438 = vmatpush3.msra.mxu1 %v5103_v57  ;;  %4406 = vmatprep.mubr.f32.mxu1 %v5039_v21 }
  0xac   : > { %4439 = vmatprep.subr.mxu1 %v5105_v58 }
  0xad   : > { %4440 = vmatpush3.msra.mxu1 %v5105_v58  ;;  %4394 = vmatmul.mubr.f32.gmra.mxu0 %v515_v42 }
  0xae   : > { %4407 = vmatmul.mubr.f32.gmra.mxu1 %v5051_v26  ;;  %4475 = vmatprep.subr.mxu1 %v5103_v57 }
  0xaf   : > { %4396 = vmatprep.mubr.f32.mxu0 %v525_v45  ;;  %4409 = vmatprep.mubr.f32.mxu1 %v5061_v31 }
  0xb1   : > { %4397 = vmatmul.mubr.f32.gmra.mxu0 %v535_v48 }
  0xb2   : > { %4410 = vmatmul.mubr.f32.gmra.mxu1 %v5071_v36  ;;  %4422 = vmatprep.mubr.f32.mxu0 %v5015_v9  ;;  %v5197_v9 = vand.u32 4294901760, %v1449_v7 }
  0xb3   : > { %4412 = vmatprep.mubr.f32.mxu1 %v5077_v41 }
  0xb5   : > { %4423 = vmatmul.mubr.f32.vlgmr.msra.gmra.mxu0 %v5049_v25  ;;  %v1221_v25 = vsel %vm343_vm0, %v305_v53, 0 }
  0xb6   : > { %4413 = vmatmul.mubr.f32.gmra.mxu1 %v5097_v52  ;;  %4457 = vmatpush3.msra.mxu0 %v572_v10  ;;  %v1236_v10 = vsel %vm343_vm0, %v310_v61, 0 }
  0xb7   : > { %4458 = vmatprep.subr.mxu0 %v579_v11  ;;  %4415 = vmatprep.mubr.f32.mxu1 %v5108_v60 }
  0xb8   : > { %4459 = vmatpush3.msra.mxu0 %v579_v11  ;;  %4425 = vmatprep.mubr.f32.mxu0 %v5058_v29  ;;  %v306_v29 = vld [vmem:[%s6034_s0 + $0x8] sm:$0xff]  ;;  %v1239_v11 = vsel %vm343_vm0, %v311_v1, 0  ;;  %v2112_v1 = vpop.permute.xlu0 %2111 }
  0xb9   : > { %4426 = vmatmul.mubr.f32.gmra.mxu0 %v5069_v35  ;;  %4494 = vmatprep.subr.mxu0 %v5162_v49  ;;  %v5222_v35 = vand.u32 4294901760, %v1221_v25  ;;  %v5308_v23 = vand.u32 4294901760, %v1239_v11 }
  0xba   : > { %4416 = vmatmul.mubr.f32.gmra.mxu1 %v5120_v3  ;;  %4428 = vmatprep.mubr.f32.mxu0 %v5081_v43 }
  0xbb   : > { %4441 = vmatprep.mubr.f32.mxu1 %v443_v12  ;;  %v5200_v12 = vand.u32 4294901760, %v5010_v8  ;;  %v5239_v56 = vsub.f32 %v1221_v25, %v5222_v35  ;;  %v5334_v40 = vsub.f32 %v1239_v11, %v5308_v23 }
  0xbd   : > { %4429 = vmatmul.mubr.f32.gmra.mxu0 %v5091_v47  ;;  %v309_v47 = vld [vmem:[%s6034_s0 + $0x20] sm:$0xff]  ;;  %v1379_v25 = vand.u32 4294901760, %v5334_v40 }
  0xbe   : > { %4442 = vmatmul.mubr.f32.vlgmr.msra.gmra.mxu1 %v453_v34  ;;  %4431 = vmatprep.mubr.f32.mxu0 %v5100_v55  ;;  %v307_v34 = vld [vmem:[%s6034_s0 + $0x10] sm:$0xff] }
  0xbf   : > { %4476 = vmatpush3.msra.mxu1 %v5103_v57  ;;  %4444 = vmatprep.mubr.f32.mxu1 %v463_v39  ;;  %v5220_v39 = vsub.f32 %v5010_v8, %v5200_v12  ;;  %v1227_v43 = vsel %vm343_vm0, %v307_v34, 0  ;;  %v308_v8 = vld [vmem:[%s6034_s0 + $0x18] sm:$0xff] }
  0xc0   : > { %4477 = vmatprep.subr.mxu1 %v5105_v58  ;;  %v5247_v55 = vand.u32 4294901760, %v1227_v43 }
  0xc1   : > { %4478 = vmatpush3.msra.mxu1 %v5105_v58  ;;  %4432 = vmatmul.mubr.f32.gmra.mxu0 %v5118_v2  ;;  %v5236_v54 = vand.u32 4294901760, %v5220_v39  ;;  %v1230_v58 = vsel %vm343_vm0, %v308_v8, 0 }
  0xc2   : > { %4445 = vmatmul.mubr.f32.gmra.mxu1 %v473_v46  ;;  %4434 = vmatprep.mubr.f32.mxu0 %v5129_v14  ;;  %v1224_v46 = vsel %vm343_vm0, %v306_v29, 0  ;;  %v5272_v2 = vsub.f32 %v1227_v43, %v5247_v55  ;;  %v5274_v4 = vand.u32 4294901760, %v1230_v58 }
  0xc3   : > { %4447 = vmatprep.mubr.f32.mxu1 %v483_v59  ;;  %4513 = vmatprep.subr.mxu1 %v5197_v9  ;;  %v5241_v57 = vand.u32 4294901760, %v1224_v46  ;;  %v1233_v59 = vsel %vm343_vm0, %v309_v47, 0  ;;  %v1456_v62 = vsub.f32 %v5220_v39, %v5236_v54  ;;  %v1380_v47 = vsub.f32 %v5334_v40, %v1379_v25 }
  0xc4   : > { %v1339_v17 = vand.u32 4294901760, %v5272_v2  ;;  %v5299_v18 = vsub.f32 %v1230_v58, %v5274_v4 }
  0xc5   : > { %4435 = vmatmul.mubr.f32.gmra.mxu0 %v5137_v22  ;;  %v5265_v0 = vsub.f32 %v1224_v46, %v5241_v57  ;;  %v1457_v14 = vand.u32 4294901760, %v1456_v62  ;;  %v1381_v61 = vand.u32 4294901760, %v1380_v47 }
  0xc6   : > { %4448 = vmatmul.mubr.f32.gmra.mxu1 %v493_v63  ;;  %4460 = vmatprep.mubr.f32.mxu0 %v5006_v6  ;;  %v1319_v63 = vand.u32 4294901760, %v5239_v56  ;;  %v1340_v32 = vsub.f32 %v5272_v2, %v1339_v17 }
  0xc7   : > { %4450 = vmatprep.mubr.f32.mxu1 %v503_v5  ;;  %v5279_v5 = vand.u32 4294901760, %v1233_v59  ;;  %v1329_v16 = vand.u32 4294901760, %v5265_v0 }
  0xc8   : > { %v1320_v15 = vsub.f32 %v5239_v56, %v1319_v63 }
  0xc9   : > { %4461 = vmatmul.mubr.f32.vlgmr.msra.gmra.mxu0 %v5037_v20  ;;  %v5306_v22 = vsub.f32 %v1233_v59, %v5279_v5  ;;  %v1330_v30 = vsub.f32 %v5265_v0, %v1329_v16 }
  0xca   : > { %4451 = vmatmul.mubr.f32.gmra.mxu1 %v513_v19  ;;  %4463 = vmatprep.mubr.f32.mxu0 %v5039_v21  ;;  %v5301_v19 = vand.u32 4294901760, %v1236_v10 }
  0xcb   : > { %4453 = vmatprep.mubr.f32.mxu1 %v523_v28  ;;  %4495 = vmatpush3.msra.mxu0 %v5162_v49  ;;  %v314_v28 = vld [vmem:[%s6034_s0 + $0x48] sm:$0xff]  ;;  %v1359_v38 = vand.u32 4294901760, %v5306_v22  ;;  %v1331_v45 = vand.u32 4294901760, %v1330_v30 }
  0xcc   : > { %4496 = vmatprep.subr.mxu0 %v5200_v12  ;;  %v5326_v33 = vsub.f32 %v1236_v10, %v5301_v19  ;;  %v1248_v44 = vsel %vm343_vm0, %v314_v28, 0  ;;  %v2114_v10 = vpop.permute.xlu1 %2113 }
  0xcd   : > { %4464 = vmatmul.mubr.f32.gmra.mxu0 %v5051_v26  ;;  %v5349_v53 = vand.u32 4294901760, %v1248_v44 }
  0xce   : > { %4454 = vmatmul.mubr.f32.gmra.mxu1 %v533_v37  ;;  %4466 = vmatprep.mubr.f32.mxu0 %v5061_v31  ;;  %v5328_v37 = vand.u32 4294901760, %v1242_v24  ;;  %v1369_v48 = vand.u32 4294901760, %v5326_v33 }
  0xcf   : > { %4479 = vmatprep.mubr.f32.mxu1 %v5006_v6  ;;  %4497 = vmatpush3.msra.mxu0 %v5200_v12  ;;  %v313_v6 = vld [vmem:[%s6034_s0 + $0x40] sm:$0xff]  ;;  %v5365_v43 = vsub.f32 %v1248_v44, %v5349_v53 }
  0xd0   : > { %4532 = vmatprep.subr.mxu0 %v5169_v50  ;;  %v1245_v27 = vsel %vm343_vm0, %v313_v6, 0  ;;  %v5347_v7 = vsub.f32 %v1242_v24, %v5328_v37  ;;  %v1370_v46 = vsub.f32 %v5326_v33, %v1369_v48  ;;  %v2108_v6 = vpop.permute.xlu0 %2107  ;;  %v2110_v24 = vpop.permute.xlu1 %2109 }
  0xd1   : > { %4467 = vmatmul.mubr.f32.gmra.mxu0 %v5071_v36  ;;  %v5336_v42 = vand.u32 4294901760, %v1245_v27  ;;  %v1409_v59 = vand.u32 4294901760, %v5365_v43 }
  0xd2   : > { %4480 = vmatmul.mubr.f32.vlgmr.msra.gmra.mxu1 %v5037_v20  ;;  %4469 = vmatprep.mubr.f32.mxu0 %v5077_v41  ;;  %v1321_v20 = vand.u32 4294901760, %v1320_v15  ;;  %v1371_v58 = vand.u32 4294901760, %v1370_v46 }
  0xd3   : > { %4514 = vmatpush3.msra.mxu1 %v5197_v9  ;;  %4482 = vmatprep.mubr.f32.mxu1 %v5039_v21  ;;  %v1349_v21 = vand.u32 4294901760, %v5299_v18  ;;  %v1360_v9 = vsub.f32 %v5306_v22, %v1359_v38  ;;  %v5357_v29 = vsub.f32 %v1245_v27, %v5336_v42  ;;  %v1410_v62 = vsub.f32 %v5365_v43, %v1409_v59 }
  0xd4   : > { %4515 = vmatprep.subr.mxu1 %v1457_v14  ;;  %v2116_v27 = vsel %vm2115_vm2, %v2108_v6, %v2110_v24 }
  0xd5   : > { %4470 = vmatmul.mubr.f32.gmra.mxu0 %v5097_v52  ;;  %4516 = vmatpush3.msra.mxu1 %v1457_v14  ;;  %v1361_v8 = vand.u32 4294901760, %v1360_v9  ;;  %v1411_v11 = vand.u32 4294901760, %v1410_v62 }
  0xd6   : > { %4483 = vmatmul.mubr.f32.gmra.mxu1 %v5051_v26  ;;  %4472 = vmatprep.mubr.f32.mxu0 %v5108_v60  ;;  %v1350_v26 = vsub.f32 %v5299_v18, %v1349_v21 }
  0xd7   : > { %4485 = vmatprep.mubr.f32.mxu1 %v5061_v31  ;;  %4551 = vmatprep.subr.mxu1 %v5162_v49  ;;  %v1341_v31 = vand.u32 4294901760, %v1340_v32 }
  0xd8   : > { %v1351_v34 = vand.u32 4294901760, %v1350_v26  ;;  %v4074_v26 = vld [vmem:[%s6034_s0 + $0xd0] sm:$0xff] }
  0xd9   : > { %4473 = vmatmul.mubr.f32.gmra.mxu0 %v5120_v3 }
  0xda   : > { %4486 = vmatmul.mubr.f32.gmra.mxu1 %v5071_v36  ;;  %4498 = vmatprep.mubr.f32.mxu0 %v1321_v20  ;;  %v1389_v36 = vand.u32 4294901760, %v5347_v7  ;;  %v4072_v20 = vld [vmem:[%s6034_s0 + $0xc0] sm:$0xff] }
  0xdb   : > { %4488 = vmatprep.mubr.f32.mxu1 %v5077_v41  ;;  %v1399_v41 = vand.u32 4294901760, %v5357_v29 }
  0xdd   : > { %4499 = vmatmul.mubr.f32.vlgmr.msra.gmra.mxu0 %v1331_v45 }
  0xde   : > { %4489 = vmatmul.mubr.f32.gmra.mxu1 %v5097_v52  ;;  %4501 = vmatprep.mubr.f32.mxu0 %v1341_v31  ;;  %v1390_v52 = vsub.f32 %v5347_v7, %v1389_v36 }
  0xdf   : > { %4491 = vmatprep.mubr.f32.mxu1 %v5108_v60  ;;  %4533 = vmatpush3.msra.mxu0 %v5169_v50  ;;  %v1400_v60 = vsub.f32 %v5357_v29, %v1399_v41 }
  0xe0   : > { %4534 = vmatprep.subr.mxu0 %v5220_v39  ;;  %v1391_v50 = vand.u32 4294901760, %v1390_v52 }
  0xe1   : > { %4502 = vmatmul.mubr.f32.gmra.mxu0 %v1351_v34 }
  0xe2   : > { %4492 = vmatmul.mubr.f32.gmra.mxu1 %v5120_v3  ;;  %4504 = vmatprep.mubr.f32.mxu0 %v1361_v8  ;;  %v1401_v3 = vand.u32 4294901760, %v1400_v60 }
  0xe3   : > { %4517 = vmatprep.mubr.f32.mxu1 %v5222_v35  ;;  %4535 = vmatpush3.msra.mxu0 %v5220_v39  ;;  %v2117_v39 = vsel %vm2115_vm2, %v2112_v1, %v2114_v10 }
  0xe4   : > { %4570 = vmatprep.subr.mxu0 %v5176_v51  ;;  %v5398_v13 = vand.u32 4294901760, %v2117_v39 }
  0xe5   : > { %4505 = vmatmul.mubr.f32.gmra.mxu0 %v1371_v58 }
  0xe6   : > { %4518 = vmatmul.mubr.f32.vlgmr.msra.gmra.mxu1 %v5241_v57  ;;  %4507 = vmatprep.mubr.f32.mxu0 %v1381_v61  ;;  %v5404_v14 = vsub.f32 %v2117_v39, %v5398_v13 }
  0xe7   : > { %4552 = vmatpush3.msra.mxu1 %v5162_v49  ;;  %4520 = vmatprep.mubr.f32.mxu1 %v5247_v55 }
  0xe8   : > { %4553 = vmatprep.subr.mxu1 %v5200_v12  ;;  %v5412_v15 = vand.u32 4294901760, %v5404_v14 }
  0xe9   : > { %4508 = vmatmul.mubr.f32.gmra.mxu0 %v1391_v50  ;;  %4554 = vmatpush3.msra.mxu1 %v5200_v12 }
  0xea   : > { %4521 = vmatmul.mubr.f32.gmra.mxu1 %v5274_v4  ;;  %4510 = vmatprep.mubr.f32.mxu0 %v1401_v3 }
  0xeb   : > { %4523 = vmatprep.mubr.f32.mxu1 %v5279_v5  ;;  %4589 = vmatprep.subr.mxu1 %v5162_v49 }
  0xed   : > { %4511 = vmatmul.mubr.f32.gmra.mxu0 %v1411_v11 }
  0xee   : > { %4524 = vmatmul.mubr.f32.gmra.mxu1 %v5301_v19  ;;  %4536 = vmatprep.mubr.f32.mxu0 %v5239_v56  ;;  %v5434_v56 = vand.u32 4294901760, %v2116_v27 }
  0xef   : > { %4526 = vmatprep.mubr.f32.mxu1 %v5308_v23 }
  0xf1   : > { %4537 = vmatmul.mubr.f32.vlgmr.msra.gmra.mxu0 %v5265_v0 }
  0xf2   : > { %4527 = vmatmul.mubr.f32.gmra.mxu1 %v5328_v37  ;;  %4539 = vmatprep.mubr.f32.mxu0 %v5272_v2  ;;  %v5453_v2 = vsub.f32 %v2116_v27, %v5434_v56 }
  0xf3   : > { %4529 = vmatprep.mubr.f32.mxu1 %v5336_v42  ;;  %4571 = vmatpush3.msra.mxu0 %v5176_v51  ;;  %v2349_v51 = vsub.f32 %v5404_v14, %v5412_v15 }
  0xf4   : > { %4572 = vmatprep.subr.mxu0 %v5236_v54 }
  0xf5   : > { %4540 = vmatmul.mubr.f32.gmra.mxu0 %v5299_v18  ;;  %v4071_v18 = vld [vmem:[%s6034_s0 + $0xb8] sm:$0xff] }
  0xf6   : > { %4530 = vmatmul.mubr.f32.gmra.mxu1 %v5349_v53  ;;  %4542 = vmatprep.mubr.f32.mxu0 %v5306_v22  ;;  %v5471_v22 = vand.u32 4294901760, %v5453_v2 }
  0xf7   : > { %4555 = vmatprep.mubr.f32.mxu1 %v1319_v63  ;;  %4573 = vmatpush3.msra.mxu0 %v5236_v54  ;;  %v5432_v54 = vand.u32 4294901760, %v2349_v51  ;;  %v4068_v63 = vld [vmem:[%s6034_s0 + $0xa0] sm:$0xff] }
  0xf8   : > { %4608 = vmatprep.subr.mxu0 %v5398_v13  ;;  %v2121_v0 = vsel %vm343_vm0, %v4068_v63, 0 }
  0xf9   : > { %4543 = vmatmul.mubr.f32.gmra.mxu0 %v5326_v33  ;;  %v2133_v33 = vsel %vm343_vm0, %v4072_v20, 0 }
  0xfa   : > { %4556 = vmatmul.mubr.f32.vlgmr.msra.gmra.mxu1 %v1329_v16  ;;  %4545 = vmatprep.mubr.f32.mxu0 %v5334_v40  ;;  %v5460_v16 = vand.u32 4294901760, %v2121_v0  ;;  %v2356_v40 = vsub.f32 %v5453_v2, %v5471_v22  ;;  %v5514_v31 = vand.u32 4294901760, %v2133_v33 }
  0xfb   : > { %4590 = vmatpush3.msra.mxu1 %v5162_v49  ;;  %4558 = vmatprep.mubr.f32.mxu1 %v1339_v17  ;;  %v4069_v49 = vld [vmem:[%s6034_s0 + $0xa8] sm:$0xff]  ;;  %v4070_v17 = vld [vmem:[%s6034_s0 + $0xb0] sm:$0xff] }
  0xfc   : > { %4591 = vmatprep.subr.mxu1 %v5200_v12  ;;  %v2127_v30 = vsel %vm343_vm0, %v4070_v17, 0  ;;  %v5484_v32 = vsub.f32 %v2121_v0, %v5460_v16  ;;  %v2357_v34 = vand.u32 4294901760, %v2356_v40  ;;  %v3022_v40 = vpop.permute.xlu0 %3021 }
  0xfd   : > { %4546 = vmatmul.mubr.f32.gmra.mxu0 %v5347_v7  ;;  %4592 = vmatpush3.msra.mxu1 %v5200_v12  ;;  %v2124_v12 = vsel %vm343_vm0, %v4069_v49, 0  ;;  %v5501_v45 = vand.u32 4294901760, %v2127_v30 }
  0xfe   : > { %4559 = vmatmul.mubr.f32.gmra.mxu1 %v1349_v21  ;;  %4548 = vmatprep.mubr.f32.mxu0 %v5357_v29  ;;  %v5473_v28 = vand.u32 4294901760, %v2124_v12  ;;  %v2130_v21 = vsel %vm343_vm0, %v4071_v18, 0  ;;  %v2219_v7 = vand.u32 4294901760, %v5484_v32  ;;  %v4075_v29 = vld [vmem:[%s6034_s0 + $0xd8] sm:$0xff] }
  0xff   : > { %4561 = vmatprep.mubr.f32.mxu1 %v1359_v38  ;;  %4627 = vmatprep.subr.mxu1 %v5432_v54  ;;  %v4073_v38 = vld [vmem:[%s6034_s0 + $0xc8] sm:$0xff]  ;;  %v2142_v52 = vsel %vm343_vm0, %v4075_v29, 0 }
 0x100   : > { %v5499_v44 = vsub.f32 %v2124_v12, %v5473_v28  ;;  %v2136_v9 = vsel %vm343_vm0, %v4073_v38, 0  ;;  %v2220_v47 = vsub.f32 %v5484_v32, %v2219_v7  ;;  %v5561_v62 = vand.u32 4294901760, %v2142_v52 }
 0x101   : > { %4549 = vmatmul.mubr.f32.gmra.mxu0 %v5365_v43  ;;  %v5530_v8 = vand.u32 4294901760, %v2136_v9 }
 0x102   : > { %4562 = vmatmul.mubr.f32.gmra.mxu1 %v1369_v48  ;;  %4574 = vmatprep.mubr.f32.mxu0 %v5222_v35  ;;  %v5508_v48 = vand.u32 4294901760, %v2130_v21  ;;  %v2229_v46 = vand.u32 4294901760, %v5499_v44  ;;  %v2221_v3 = vand.u32 4294901760, %v2220_v47  ;;  %v5583_v27 = vsub.f32 %v2142_v52, %v5561_v62 }
 0x103   : > { %4564 = vmatprep.mubr.f32.mxu1 %v1379_v25  ;;  %v2139_v25 = vsel %vm343_vm0, %v4074_v26, 0  ;;  %v3024_v26 = vpop.permute.xlu1 %3023 }
 0x104   : > { %v5528_v43 = vsub.f32 %v2130_v21, %v5508_v48  ;;  %v5543_v58 = vand.u32 4294901760, %v2139_v25 }
 0x105   : > { %4575 = vmatmul.mubr.f32.vlgmr.msra.gmra.mxu0 %v5241_v57 }
 0x106   : > { %4565 = vmatmul.mubr.f32.gmra.mxu1 %v1389_v36  ;;  %4609 = vmatpush3.msra.mxu0 %v5398_v13  ;;  %v5524_v36 = vsub.f32 %v2127_v30, %v5501_v45  ;;  %v2249_v50 = vand.u32 4294901760, %v5528_v43  ;;  %v5567_v10 = vsub.f32 %v2139_v25, %v5543_v58 }
 0x107   : > { %4610 = vmatprep.subr.mxu0 %v5434_v56  ;;  %4567 = vmatprep.mubr.f32.mxu1 %v1399_v41  ;;  %v5541_v41 = vsub.f32 %v2133_v33, %v5514_v31  ;;  %v3020_v47 = vpop.permute.xlu1 %3019 }
 0x108   : > { %4611 = vmatpush3.msra.mxu0 %v5434_v56  ;;  %4577 = vmatprep.mubr.f32.mxu0 %v5247_v55  ;;  %v2239_v61 = vand.u32 4294901760, %v5524_v36  ;;  %v2279_v63 = vand.u32 4294901760, %v5567_v10 }
 0x109   : > { %4646 = vmatprep.subr.mxu0 %v5404_v14  ;;  %4578 = vmatmul.mubr.f32.gmra.mxu0 %v5274_v4  ;;  %v2259_v1 = vand.u32 4294901760, %v5541_v41 }
 0x10a   : > { %4568 = vmatmul.mubr.f32.gmra.mxu1 %v1409_v59  ;;  %4580 = vmatprep.mubr.f32.mxu0 %v5279_v5  ;;  %v2230_v59 = vsub.f32 %v5499_v44, %v2229_v46  ;;  %v2240_v24 = vsub.f32 %v5524_v36, %v2239_v61  ;;  %v2280_v20 = vsub.f32 %v5567_v10, %v2279_v63 }
 0x10b   : > { %4593 = vmatprep.mubr.f32.mxu1 %v5222_v35  ;;  %v4076_v35 = vld [vmem:[%s6034_s0 + $0xe0] sm:$0xff] }
 0x10c   : > { %v2145_v60 = vsel %vm343_vm0, %v4076_v35, 0  ;;  %v2231_v6 = vand.u32 4294901760, %v2230_v59  ;;  %v2241_v0 = vand.u32 4294901760, %v2240_v24  ;;  %v2281_v33 = vand.u32 4294901760, %v2280_v20 }
 0x10d   : > { %4581 = vmatmul.mubr.f32.gmra.mxu0 %v5301_v19  ;;  %v5572_v11 = vand.u32 4294901760, %v2145_v60 }
 0x10e   : > { %4594 = vmatmul.mubr.f32.vlgmr.msra.gmra.mxu1 %v5241_v57  ;;  %4583 = vmatprep.mubr.f32.mxu0 %v5308_v23  ;;  %v4077_v57 = vld [vmem:[%s6034_s0 + $0xe8] sm:$0xff] }
 0x10f   : > { %4628 = vmatpush3.msra.mxu1 %v5432_v54  ;;  %4596 = vmatprep.mubr.f32.mxu1 %v5247_v55  ;;  %v5559_v55 = vsub.f32 %v2136_v9, %v5530_v8  ;;  %v2148_v39 = vsel %vm343_vm0, %v4077_v57, 0  ;;  %v5594_v49 = vsub.f32 %v2145_v60, %v5572_v11  ;;  %v3027_v9 = vsel %vm3025_vm3, %v3022_v40, %v3024_v26  ;;  %v4082_v60 = vld [vmem:[%s6034_s0 + $0x110] sm:$0xff] }
 0x110   : > { %4629 = vmatprep.subr.mxu1 %v2357_v34  ;;  %v5585_v54 = vand.u32 4294901760, %v2148_v39  ;;  %v5634_v29 = vand.u32 4294901760, %v3027_v9 }
 0x111   : > { %4630 = vmatpush3.msra.mxu1 %v2357_v34  ;;  %4584 = vmatmul.mubr.f32.gmra.mxu0 %v5328_v37  ;;  %v2269_v51 = vand.u32 4294901760, %v5559_v55  ;;  %v2299_v30 = vand.u32 4294901760, %v5594_v49 }
 0x112   : > { %4665 = vmatprep.subr.mxu1 %v5398_v13  ;;  %4597 = vmatmul.mubr.f32.gmra.mxu1 %v5274_v4  ;;  %v2250_v4 = vsub.f32 %v5528_v43, %v2249_v50  ;;  %v5601_v18 = vsub.f32 %v2148_v39, %v5585_v54  ;;  %v5640_v34 = vsub.f32 %v3027_v9, %v5634_v29 }
 0x113   : > { %4586 = vmatprep.mubr.f32.mxu0 %v5336_v42  ;;  %4599 = vmatprep.mubr.f32.mxu1 %v5279_v5  ;;  %v2260_v5 = vsub.f32 %v5541_v41, %v2259_v1  ;;  %v2270_v17 = vsub.f32 %v5559_v55, %v2269_v51 }
 0x114   : > { %v2251_v12 = vand.u32 4294901760, %v2250_v4  ;;  %v2309_v21 = vand.u32 4294901760, %v5601_v18  ;;  %v5648_v35 = vand.u32 4294901760, %v5640_v34  ;;  %v4084_v4 = vld [vmem:[%s6034_s0 + $0x120] sm:$0xff] }
 0x115   : > { %4587 = vmatmul.mubr.f32.gmra.mxu0 %v5349_v53 }
 0x116   : > { %4600 = vmatmul.mubr.f32.gmra.mxu1 %v5301_v19  ;;  %4612 = vmatprep.mubr.f32.mxu0 %v2221_v3  ;;  %v2289_v19 = vand.u32 4294901760, %v5583_v27  ;;  %v2310_v38 = vsub.f32 %v5601_v18, %v2309_v21  ;;  %v3259_v52 = vsub.f32 %v5640_v34, %v5648_v35 }
 0x117   : > { %4602 = vmatprep.mubr.f32.mxu1 %v5308_v23  ;;  %v2261_v23 = vand.u32 4294901760, %v2260_v5 }
 0x118   : > { %v2311_v25 = vand.u32 4294901760, %v2310_v38  ;;  %v5668_v57 = vand.u32 4294901760, %v3259_v52 }
 0x119   : > { %4613 = vmatmul.mubr.f32.vlgmr.msra.gmra.mxu0 %v2231_v6 }
 0x11a   : > { %4603 = vmatmul.mubr.f32.gmra.mxu1 %v5328_v37  ;;  %4647 = vmatpush3.msra.mxu0 %v5404_v14  ;;  %v2271_v37 = vand.u32 4294901760, %v2270_v17  ;;  %v2290_v14 = vsub.f32 %v5583_v27, %v2289_v19 }
 0x11b   : > { %4648 = vmatprep.subr.mxu0 %v5453_v2  ;;  %4605 = vmatprep.mubr.f32.mxu1 %v5336_v42  ;;  %v2300_v42 = vsub.f32 %v5594_v49, %v2299_v30 }
 0x11c   : > { %4649 = vmatpush3.msra.mxu0 %v5453_v2  ;;  %4615 = vmatprep.mubr.f32.mxu0 %v2241_v0  ;;  %v2291_v2 = vand.u32 4294901760, %v2290_v14  ;;  %v4085_v0 = vld [vmem:[%s6034_s0 + $0x128] sm:$0xff] }
 0x11d   : > { %4684 = vmatprep.subr.mxu0 %v5412_v15  ;;  %4616 = vmatmul.mubr.f32.gmra.mxu0 %v2251_v12  ;;  %v3052_v14 = vsel %vm343_vm0, %v4085_v0, 0 }
 0x11e   : > { %4606 = vmatmul.mubr.f32.gmra.mxu1 %v5349_v53  ;;  %4618 = vmatprep.mubr.f32.mxu0 %v2261_v23  ;;  %v2301_v53 = vand.u32 4294901760, %v2300_v42  ;;  %v5797_v38 = vand.u32 4294901760, %v3052_v14 }
 0x11f   : > { %4631 = vmatprep.mubr.f32.mxu1 %v5460_v16 }
 0x121   : > { %4619 = vmatmul.mubr.f32.gmra.mxu0 %v2271_v37 }
 0x122   : > { %4632 = vmatmul.mubr.f32.vlgmr.msra.gmra.mxu1 %v5473_v28  ;;  %4621 = vmatprep.mubr.f32.mxu0 %v2281_v33 }
 0x123   : > { %4666 = vmatpush3.msra.mxu1 %v5398_v13  ;;  %4634 = vmatprep.mubr.f32.mxu1 %v5501_v45 }
 0x124   : > { %4667 = vmatprep.subr.mxu1 %v5434_v56 }
 0x125   : > { %4668 = vmatpush3.msra.mxu1 %v5434_v56  ;;  %4622 = vmatmul.mubr.f32.gmra.mxu0 %v2291_v2 }
 0x126   : > { %4703 = vmatprep.subr.mxu1 %v5398_v13  ;;  %4635 = vmatmul.mubr.f32.gmra.mxu1 %v5508_v48 }
 0x127   : > { %4624 = vmatprep.mubr.f32.mxu0 %v2301_v53  ;;  %4637 = vmatprep.mubr.f32.mxu1 %v5514_v31 }
 0x129   : > { %4625 = vmatmul.mubr.f32.gmra.mxu0 %v2311_v25 }
 0x12a   : > { %4638 = vmatmul.mubr.f32.gmra.mxu1 %v5530_v8  ;;  %4650 = vmatprep.mubr.f32.mxu0 %v5484_v32 }
 0x12b   : > { %4640 = vmatprep.mubr.f32.mxu1 %v5543_v58 }
 0x12d   : > { %4651 = vmatmul.mubr.f32.vlgmr.msra.gmra.mxu0 %v5499_v44 }
 0x12e   : > { %4641 = vmatmul.mubr.f32.gmra.mxu1 %v5561_v62  ;;  %4685 = vmatpush3.msra.mxu0 %v5412_v15  ;;  %v3018_v15 = vpop.permute.xlu0 %3017 }
 0x12f   : > { %4686 = vmatprep.subr.mxu0 %v5471_v22  ;;  %4643 = vmatprep.mubr.f32.mxu1 %v5572_v11 }
 0x130   : > { %4687 = vmatpush3.msra.mxu0 %v5471_v22  ;;  %4653 = vmatprep.mubr.f32.mxu0 %v5524_v36  ;;  %v3026_v22 = vsel %vm3025_vm3, %v3018_v15, %v3020_v47 }
 0x131   : > { %4654 = vmatmul.mubr.f32.gmra.mxu0 %v5528_v43  ;;  %4722 = vmatprep.subr.mxu0 %v5634_v29  ;;  %v5671_v32 = vand.u32 4294901760, %v3026_v22  ;;  %v4080_v43 = vld [vmem:[%s6034_s0 + $0x100] sm:$0xff] }
 0x132   : > { %4644 = vmatmul.mubr.f32.gmra.mxu1 %v5585_v54  ;;  %4656 = vmatprep.mubr.f32.mxu0 %v5541_v41  ;;  %v4081_v41 = vld [vmem:[%s6034_s0 + $0x108] sm:$0xff] }
 0x133   : > { %4669 = vmatprep.mubr.f32.mxu1 %v2219_v7  ;;  %v4078_v7 = vld [vmem:[%s6034_s0 + $0xf0] sm:$0xff]  ;;  %v3040_v3 = vsel %vm343_vm0, %v4081_v41, 0 }
 0x134   : > { %v3031_v44 = vsel %vm343_vm0, %v4078_v7, 0 }
 0x135   : > { %4657 = vmatmul.mubr.f32.gmra.mxu0 %v5559_v55  ;;  %v5696_v36 = vand.u32 4294901760, %v3031_v44 }
 0x136   : > { %4670 = vmatmul.mubr.f32.vlgmr.msra.gmra.mxu1 %v2229_v46  ;;  %4659 = vmatprep.mubr.f32.mxu0 %v5567_v10  ;;  %v4083_v10 = vld [vmem:[%s6034_s0 + $0x118] sm:$0xff] }
 0x137   : > { %4704 = vmatpush3.msra.mxu1 %v5398_v13  ;;  %4672 = vmatprep.mubr.f32.mxu1 %v2239_v61  ;;  %v4079_v13 = vld [vmem:[%s6034_s0 + $0xf8] sm:$0xff]  ;;  %v5720_v55 = vsub.f32 %v3031_v44, %v5696_v36 }
 0x138   : > { %4705 = vmatprep.subr.mxu1 %v5434_v56  ;;  %v3034_v46 = vsel %vm343_vm0, %v4079_v13, 0 }
 0x139   : > { %4706 = vmatpush3.msra.mxu1 %v5434_v56  ;;  %4660 = vmatmul.mubr.f32.gmra.mxu0 %v5583_v27  ;;  %v5689_v56 = vsub.f32 %v3026_v22, %v5671_v32  ;;  %v5709_v61 = vand.u32 4294901760, %v3034_v46  ;;  %v3129_v27 = vand.u32 4294901760, %v5720_v55  ;;  %v5819_v22 = vsub.f32 %v3052_v14, %v5797_v38 }
 0x13a   : > { %4673 = vmatmul.mubr.f32.gmra.mxu1 %v2249_v50  ;;  %4662 = vmatprep.mubr.f32.mxu0 %v5594_v49  ;;  %v3037_v50 = vsel %vm343_vm0, %v4080_v43, 0  ;;  %v3049_v49 = vsel %vm343_vm0, %v4084_v4, 0 }
 0x13b   : > { %4675 = vmatprep.mubr.f32.mxu1 %v2259_v1  ;;  %4741 = vmatprep.subr.mxu1 %v5668_v57  ;;  %v5707_v59 = vand.u32 4294901760, %v5689_v56  ;;  %v3043_v1 = vsel %vm343_vm0, %v4082_v60, 0  ;;  %v5735_v6 = vsub.f32 %v3034_v46, %v5709_v61  ;;  %v5737_v24 = vand.u32 4294901760, %v3037_v50 }
 0x13c   : > { %v5750_v5 = vand.u32 4294901760, %v3043_v1  ;;  %v3130_v20 = vsub.f32 %v5720_v55, %v3129_v27  ;;  %v5779_v37 = vand.u32 4294901760, %v3049_v49 }
 0x13d   : > { %4663 = vmatmul.mubr.f32.gmra.mxu0 %v5601_v18  ;;  %v3266_v39 = vsub.f32 %v5689_v56, %v5707_v59  ;;  %v3139_v17 = vand.u32 4294901760, %v5735_v6 }
 0x13e   : > { %4676 = vmatmul.mubr.f32.gmra.mxu1 %v2269_v51  ;;  %4688 = vmatprep.mubr.f32.mxu0 %v5460_v16  ;;  %v5744_v51 = vand.u32 4294901760, %v3040_v3  ;;  %v3131_v53 = vand.u32 4294901760, %v3130_v20  ;;  %v5803_v26 = vsub.f32 %v3049_v49, %v5779_v37 }
 0x13f   : > { %4678 = vmatprep.mubr.f32.mxu1 %v2279_v63  ;;  %v3046_v63 = vsel %vm343_vm0, %v4083_v10, 0  ;;  %v3267_v12 = vand.u32 4294901760, %v3266_v39 }
 0x140   : > { %v5764_v18 = vsub.f32 %v3040_v3, %v5744_v51  ;;  %v5766_v23 = vand.u32 4294901760, %v3046_v63  ;;  %v3189_v7 = vand.u32 4294901760, %v5803_v26 }
 0x141   : > { %4689 = vmatmul.mubr.f32.vlgmr.msra.gmra.mxu0 %v5473_v28 }
 0x142   : > { %4679 = vmatmul.mubr.f32.gmra.mxu1 %v2289_v19  ;;  %4723 = vmatpush3.msra.mxu0 %v5634_v29  ;;  %v5760_v19 = vsub.f32 %v3037_v50, %v5737_v24  ;;  %v3159_v2 = vand.u32 4294901760, %v5764_v18  ;;  %v3190_v60 = vsub.f32 %v5803_v26, %v3189_v7 }
 0x143   : > { %4724 = vmatprep.subr.mxu0 %v5671_v32  ;;  %4681 = vmatprep.mubr.f32.mxu1 %v2299_v30  ;;  %v5777_v30 = vsub.f32 %v3043_v1, %v5750_v5 }
 0x144   : > { %4725 = vmatpush3.msra.mxu0 %v5671_v32  ;;  %4691 = vmatprep.mubr.f32.mxu0 %v5501_v45  ;;  %v3149_v33 = vand.u32 4294901760, %v5760_v19  ;;  %v3191_v1 = vand.u32 4294901760, %v3190_v60 }
 0x145   : > { %4760 = vmatprep.subr.mxu0 %v5640_v34  ;;  %4692 = vmatmul.mubr.f32.gmra.mxu0 %v5508_v48  ;;  %v3169_v40 = vand.u32 4294901760, %v5777_v30 }
 0x146   : > { %4682 = vmatmul.mubr.f32.gmra.mxu1 %v2309_v21  ;;  %4694 = vmatprep.mubr.f32.mxu0 %v5514_v31  ;;  %v3140_v21 = vsub.f32 %v5735_v6, %v3139_v17  ;;  %v3150_v47 = vsub.f32 %v5760_v19, %v3149_v33 }
 0x147   : > { %4707 = vmatprep.mubr.f32.mxu1 %v5460_v16  ;;  %v4086_v16 = vld [vmem:[%s6034_s0 + $0x130] sm:$0xff] }
 0x148   : > { %v3055_v42 = vsel %vm343_vm0, %v4086_v16, 0  ;;  %v3141_v15 = vand.u32 4294901760, %v3140_v21  ;;  %v3151_v44 = vand.u32 4294901760, %v3150_v47 }
 0x149   : > { %4695 = vmatmul.mubr.f32.gmra.mxu0 %v5530_v8  ;;  %v5808_v25 = vand.u32 4294901760, %v3055_v42 }
 0x14a   : > { %4708 = vmatmul.mubr.f32.vlgmr.msra.gmra.mxu1 %v5473_v28  ;;  %4697 = vmatprep.mubr.f32.mxu0 %v5543_v58  ;;  %v4087_v28 = vld [vmem:[%s6034_s0 + $0x138] sm:$0xff] }
 0x14b   : > { %4742 = vmatpush3.msra.mxu1 %v5668_v57  ;;  %4710 = vmatprep.mubr.f32.mxu1 %v5501_v45  ;;  %v5795_v45 = vsub.f32 %v3046_v63, %v5766_v23  ;;  %v3058_v9 = vsel %vm343_vm0, %v4087_v28, 0  ;;  %v5830_v13 = vsub.f32 %v3055_v42, %v5808_v25 }
 0x14c   : > { %4743 = vmatprep.subr.mxu1 %v3267_v12  ;;  %v5821_v57 = vand.u32 4294901760, %v3058_v9 }
 0x14d   : > { %4744 = vmatpush3.msra.mxu1 %v3267_v12  ;;  %4698 = vmatmul.mubr.f32.gmra.mxu0 %v5561_v62  ;;  %v3179_v52 = vand.u32 4294901760, %v5795_v45  ;;  %v3209_v50 = vand.u32 4294901760, %v5830_v13 }
 0x14e   : > { %4779 = vmatprep.subr.mxu1 %v5634_v29  ;;  %4711 = vmatmul.mubr.f32.gmra.mxu1 %v5508_v48  ;;  %v3160_v48 = vsub.f32 %v5764_v18, %v3159_v2  ;;  %v5837_v41 = vsub.f32 %v3058_v9, %v5821_v57 }
 0x14f   : > { %4700 = vmatprep.mubr.f32.mxu0 %v5572_v11  ;;  %4713 = vmatprep.mubr.f32.mxu1 %v5514_v31  ;;  %v3170_v31 = vsub.f32 %v5777_v30, %v3169_v40  ;;  %v3180_v43 = vsub.f32 %v5795_v45, %v3179_v52 }
 0x150   : > { %v3161_v46 = vand.u32 4294901760, %v3160_v48  ;;  %v3219_v3 = vand.u32 4294901760, %v5837_v41 }
 0x151   : > { %4701 = vmatmul.mubr.f32.gmra.mxu0 %v5585_v54 }
 0x152   : > { %4714 = vmatmul.mubr.f32.gmra.mxu1 %v5530_v8  ;;  %4726 = vmatprep.mubr.f32.mxu0 %v3131_v53  ;;  %v3199_v8 = vand.u32 4294901760, %v5819_v22  ;;  %v3220_v10 = vsub.f32 %v5837_v41, %v3219_v3 }
 0x153   : > { %4716 = vmatprep.mubr.f32.mxu1 %v5543_v58  ;;  %v3171_v58 = vand.u32 4294901760, %v3170_v31 }
 0x154   : > { %v3221_v4 = vand.u32 4294901760, %v3220_v10 }
 0x155   : > { %4727 = vmatmul.mubr.f32.vlgmr.msra.gmra.mxu0 %v3141_v15 }
 0x156   : > { %4717 = vmatmul.mubr.f32.gmra.mxu1 %v5561_v62  ;;  %4761 = vmatpush3.msra.mxu0 %v5640_v34  ;;  %v3181_v62 = vand.u32 4294901760, %v3180_v43  ;;  %v3200_v34 = vsub.f32 %v5819_v22, %v3199_v8 }
 0x157   : > { %4762 = vmatprep.subr.mxu0 %v5689_v56  ;;  %4719 = vmatprep.mubr.f32.mxu1 %v5572_v11  ;;  %v3210_v11 = vsub.f32 %v5830_v13, %v3209_v50 }
 0x158   : > { %4763 = vmatpush3.msra.mxu0 %v5689_v56  ;;  %4729 = vmatprep.mubr.f32.mxu0 %v3151_v44  ;;  %v3201_v56 = vand.u32 4294901760, %v3200_v34 }
 0x159   : > { %4798 = vmatprep.subr.mxu0 %v5648_v35  ;;  %4730 = vmatmul.mubr.f32.gmra.mxu0 %v3161_v46 }
 0x15a   : > { %4720 = vmatmul.mubr.f32.gmra.mxu1 %v5585_v54  ;;  %4732 = vmatprep.mubr.f32.mxu0 %v3171_v58  ;;  %v3211_v54 = vand.u32 4294901760, %v3210_v11 }
 0x15b   : > { %4745 = vmatprep.mubr.f32.mxu1 %v5696_v36 }
 0x15d   : > { %4733 = vmatmul.mubr.f32.gmra.mxu0 %v3181_v62 }
 0x15e   : > { %4746 = vmatmul.mubr.f32.vlgmr.msra.gmra.mxu1 %v5709_v61  ;;  %4735 = vmatprep.mubr.f32.mxu0 %v3191_v1 }
 0x15f   : > { %4780 = vmatpush3.msra.mxu1 %v5634_v29  ;;  %4748 = vmatprep.mubr.f32.mxu1 %v5737_v24 }
 0x160   : > { %4781 = vmatprep.subr.mxu1 %v5671_v32 }
 0x161   : > { %4782 = vmatpush3.msra.mxu1 %v5671_v32  ;;  %v4386_v39 = vpop.f32.mrf.mxu0  ;;  %4736 = vmatmul.mubr.f32.gmra.mxu0 %v3201_v56 }
 0x162   : > { %4817 = vmatprep.subr.mxu1 %v5634_v29  ;;  %4749 = vmatmul.mubr.f32.gmra.mxu1 %v5744_v51 }
 0x163   : > { %v447_v63 = vpop.f32.mrf.mxu0  ;;  %4738 = vmatprep.mubr.f32.mxu0 %v3211_v54  ;;  %4751 = vmatprep.mubr.f32.mxu1 %v5750_v5 }
 0x165   : > { %v4389_v49 = vpop.f32.mrf.mxu0  ;;  %4739 = vmatmul.mubr.f32.gmra.mxu0 %v3221_v4 }
 0x166   : > { %4752 = vmatmul.mubr.f32.gmra.mxu1 %v5766_v23  ;;  %4764 = vmatprep.mubr.f32.mxu0 %v5720_v55 }
 0x167   : > { %v467_v0 = vpop.f32.mrf.mxu0  ;;  %4754 = vmatprep.mubr.f32.mxu1 %v5779_v37 }
 0x169   : > { %v4392_v12 = vpop.f32.mrf.mxu0  ;;  %v4405_v16 = vpop.f32.mrf.mxu1  ;;  %4765 = vmatmul.mubr.f32.vlgmr.msra.gmra.mxu0 %v5735_v6 }
 0x16a   : > { %v625_v20 = vadd.f32 %v4405_v16, %v4386_v39  ;;  %4755 = vmatmul.mubr.f32.gmra.mxu1 %v5797_v38  ;;  %4799 = vmatpush3.msra.mxu0 %v5648_v35 }
 0x16b   : > { %4800 = vmatprep.subr.mxu0 %v5707_v59  ;;  %v487_v14 = vpop.f32.mrf.mxu0  ;;  %v618_v28 = vpop.f32.mrf.mxu1  ;;  %4757 = vmatprep.mubr.f32.mxu1 %v5808_v25 }
 0x16c   : > { %v619_v21 = vadd.f32 %v618_v28, %v447_v63  ;;  %4801 = vmatpush3.msra.mxu0 %v5707_v59  ;;  %4767 = vmatprep.mubr.f32.mxu0 %v5760_v19 }
 0x16d   : > { %v4395_v42 = vpop.f32.mrf.mxu0  ;;  %4768 = vmatmul.mubr.f32.gmra.mxu0 %v5764_v18 }
 0x16e   : > { %v4408_v53 = vpop.f32.mrf.mxu1  ;;  %4758 = vmatmul.mubr.f32.gmra.mxu1 %v5821_v57  ;;  %4770 = vmatprep.mubr.f32.mxu0 %v5777_v30 }
 0x16f   : > { %v637_v35 = vadd.f32 %v4408_v53, %v4389_v49  ;;  %v507_v9 = vpop.f32.mrf.mxu0  ;;  %4783 = vmatprep.mubr.f32.mxu1 %v3129_v27 }
 0x170   : > { %v630_v15 = vpop.f32.mrf.mxu1 }
 0x171   : > { %v631_v47 = vadd.f32 %v630_v15, %v467_v0  ;;  %v4398_v48 = vpop.f32.mrf.mxu0  ;;  %4771 = vmatmul.mubr.f32.gmra.mxu0 %v5795_v45 }
 0x172   : > { %v4411_v59 = vpop.f32.mrf.mxu1  ;;  %4784 = vmatmul.mubr.f32.vlgmr.msra.gmra.mxu1 %v3139_v17  ;;  %4773 = vmatprep.mubr.f32.mxu0 %v5803_v26 }
 0x173   : > { %v649_v31 = vadd.f32 %v4411_v59, %v4392_v12  ;;  %4818 = vmatpush3.msra.mxu1 %v5634_v29  ;;  %v527_v44 = vpop.f32.mrf.mxu0  ;;  %4786 = vmatprep.mubr.f32.mxu1 %v3149_v33 }
 0x174   : > { %4819 = vmatprep.subr.mxu1 %v5671_v32  ;;  %v642_v55 = vpop.f32.mrf.mxu1 }
 0x175   : > { %v643_v27 = vadd.f32 %v642_v55, %v487_v14  ;;  %4820 = vmatpush3.msra.mxu1 %v5671_v32  ;;  %v4424_v46 = vpop.f32.mrf.mxu0  ;;  %4774 = vmatmul.mubr.f32.gmra.mxu0 %v5819_v22 }
 0x176   : > { %v4414_v6 = vpop.f32.mrf.mxu1  ;;  %v756_v17 = vadd.f32 %v4424_v46, %v625_v20  ;;  %4787 = vmatmul.mubr.f32.gmra.mxu1 %v3159_v2  ;;  %4776 = vmatprep.mubr.f32.mxu0 %v5830_v13 }
 0x177   : > { %v661_v29 = vadd.f32 %v4414_v6, %v4395_v42  ;;  %v748_v43 = vpop.f32.mrf.mxu0  ;;  %4789 = vmatprep.mubr.f32.mxu1 %v3169_v40 }
 0x178   : > { %v654_v19 = vpop.f32.mrf.mxu1  ;;  %v749_v33 = vadd.f32 %v748_v43, %v619_v21 }
 0x179   : > { %v655_v58 = vadd.f32 %v654_v19, %v507_v9  ;;  %v4427_v60 = vpop.f32.mrf.mxu0  ;;  %4777 = vmatmul.mubr.f32.gmra.mxu0 %v5837_v41 }
 0x17a   : > { %v4417_v32 = vpop.f32.mrf.mxu1  ;;  %v770_v62 = vadd.f32 %v4427_v60, %v637_v35  ;;  %4790 = vmatmul.mubr.f32.gmra.mxu1 %v3179_v52  ;;  %4802 = vmatprep.mubr.f32.mxu0 %v5696_v36 }
 0x17b   : > { %v673_v18 = vadd.f32 %v4417_v32, %v4398_v48  ;;  %v762_v2 = vpop.f32.mrf.mxu0  ;;  %4792 = vmatprep.mubr.f32.mxu1 %v3189_v7 }
 0x17c   : > { %v666_v30 = vpop.f32.mrf.mxu1  ;;  %v763_v40 = vadd.f32 %v762_v2, %v631_v47 }
 0x17d   : > { %v667_v34 = vadd.f32 %v666_v30, %v527_v44  ;;  %v4430_v1 = vpop.f32.mrf.mxu0  ;;  %4803 = vmatmul.mubr.f32.vlgmr.msra.gmra.mxu0 %v5709_v61 }
 0x17e   : > { %v784_v11 = vadd.f32 %v4430_v1, %v649_v31  ;;  %v4443_v56 = vpop.f32.mrf.mxu1  ;;  %4793 = vmatmul.mubr.f32.gmra.mxu1 %v3199_v8  ;;  %4805 = vmatprep.mubr.f32.mxu0 %v5737_v24 }
 0x17f   : > { %v895_v45 = vadd.f32 %v4443_v56, %v756_v17  ;;  %v776_v52 = vpop.f32.mrf.mxu0  ;;  %4795 = vmatprep.mubr.f32.mxu1 %v3209_v50 }
 0x180   : > { %v777_v26 = vadd.f32 %v776_v52, %v643_v27  ;;  %v886_v7 = vpop.f32.mrf.mxu1 }
 0x181   : > { %v887_v10 = vadd.f32 %v886_v7, %v749_v33  ;;  %v4433_v54 = vpop.f32.mrf.mxu0  ;;  %4806 = vmatmul.mubr.f32.gmra.mxu0 %v5744_v51 }
 0x182   : > { %v798_v39 = vadd.f32 %v4433_v54, %v661_v29  ;;  %v4446_v4 = vpop.f32.mrf.mxu1  ;;  %4796 = vmatmul.mubr.f32.gmra.mxu1 %v3219_v3  ;;  %4808 = vmatprep.mubr.f32.mxu0 %v5750_v5 }
 0x183   : > { %v911_v22 = vadd.f32 %v4446_v4, %v770_v62  ;;  %v790_v8 = vpop.f32.mrf.mxu0  ;;  %4821 = vmatprep.mubr.f32.mxu1 %v5696_v36 }
 0x184   : > { %v791_v63 = vadd.f32 %v790_v8, %v655_v58  ;;  %v902_v13 = vpop.f32.mrf.mxu1 }
 0x185   : > { %v903_v50 = vadd.f32 %v902_v13, %v763_v40  ;;  %v4436_v49 = vpop.f32.mrf.mxu0  ;;  %4809 = vmatmul.mubr.f32.gmra.mxu0 %v5766_v23 }
 0x186   : > { %v812_v0 = vadd.f32 %v4436_v49, %v673_v18  ;;  %v4449_v12 = vpop.f32.mrf.mxu1  ;;  %4822 = vmatmul.mubr.f32.vlgmr.msra.gmra.mxu1 %v5709_v61  ;;  %4811 = vmatprep.mubr.f32.mxu0 %v5779_v37 }
 0x187   : > { %v927_v41 = vadd.f32 %v4449_v12, %v784_v11  ;;  %v804_v3 = vpop.f32.mrf.mxu0  ;;  %4824 = vmatprep.mubr.f32.mxu1 %v5737_v24 }
 0x188   : > { %v805_v16 = vadd.f32 %v804_v3, %v667_v34  ;;  %v918_v20 = vpop.f32.mrf.mxu1 }
 0x189   : > { %v919_v14 = vadd.f32 %v918_v20, %v777_v26  ;;  %v4462_v36 = vpop.f32.mrf.mxu0  ;;  %4812 = vmatmul.mubr.f32.gmra.mxu0 %v5797_v38 }
 0x18a   : > { %v4452_v28 = vpop.f32.mrf.mxu1  ;;  %v1042_v21 = vadd.f32 %v4462_v36, %v895_v45  ;;  %4825 = vmatmul.mubr.f32.gmra.mxu1 %v5744_v51  ;;  %4814 = vmatprep.mubr.f32.mxu0 %v5808_v25 }
 0x18b   : > { %v943_v42 = vadd.f32 %v4452_v28, %v798_v39  ;;  %v1035_v61 = vpop.f32.mrf.mxu0  ;;  %4827 = vmatprep.mubr.f32.mxu1 %v5750_v5 }
 0x18c   : > { %v934_v53 = vpop.f32.mrf.mxu1  ;;  %v1036_v35 = vadd.f32 %v1035_v61, %v887_v10 }
 0x18d   : > { %v935_v9 = vadd.f32 %v934_v53, %v791_v63  ;;  %v4465_v24 = vpop.f32.mrf.mxu0  ;;  %4815 = vmatmul.mubr.f32.gmra.mxu0 %v5821_v57 }
 0x18e   : > { %v4455_v15 = vpop.f32.mrf.mxu1  ;;  %v1054_v47 = vadd.f32 %v4465_v24, %v911_v22  ;;  %4828 = vmatmul.mubr.f32.gmra.mxu1 %v5766_v23 }
 0x18f   : > { %v959_v48 = vadd.f32 %v4455_v15, %v812_v0  ;;  %v1047_v59 = vpop.f32.mrf.mxu0  ;;  %4830 = vmatprep.mubr.f32.mxu1 %v5779_v37 }
 0x190   : > { %v950_v51 = vpop.f32.mrf.mxu1  ;;  %v1048_v31 = vadd.f32 %v1047_v59, %v903_v50 }
 0x191   : > { %v951_v44 = vadd.f32 %v950_v51, %v805_v16  ;;  %v4468_v55 = vpop.f32.mrf.mxu0 }
 0x192   : > { %v1066_v27 = vadd.f32 %v4468_v55, %v927_v41  ;;  %v4481_v5 = vpop.f32.mrf.mxu1  ;;  %4831 = vmatmul.mubr.f32.gmra.mxu1 %v5797_v38 }
 0x193   : > { %v1169_v46 = vadd.f32 %v4481_v5, %v1042_v21  ;;  %v1059_v6 = vpop.f32.mrf.mxu0  ;;  %4833 = vmatprep.mubr.f32.mxu1 %v5808_v25 }
 0x194   : > { %v1060_v17 = vadd.f32 %v1059_v6, %v919_v14  ;;  %v1162_v29 = vpop.f32.mrf.mxu1 }
 0x195   : > { %v1163_v43 = vadd.f32 %v1162_v29, %v1036_v35  ;;  %v4471_v23 = vpop.f32.mrf.mxu0 }
 0x196   : > { %v1078_v19 = vadd.f32 %v4471_v23, %v943_v42  ;;  %v4484_v33 = vpop.f32.mrf.mxu1  ;;  %4834 = vmatmul.mubr.f32.gmra.mxu1 %v5821_v57 }
 0x197   : > { %v1181_v37 = vadd.f32 %v4484_v33, %v1054_v47  ;;  %v1071_v58 = vpop.f32.mrf.mxu0 }
 0x198   : > { %v1072_v60 = vadd.f32 %v1071_v58, %v935_v9  ;;  %v1174_v32 = vpop.f32.mrf.mxu1 }
 0x199   : > { %v1175_v62 = vadd.f32 %v1174_v32, %v1048_v31  ;;  %v4474_v18 = vpop.f32.mrf.mxu0 }
 0x19a   : > { %v1090_v2 = vadd.f32 %v4474_v18, %v959_v48  ;;  %v4487_v38 = vpop.f32.mrf.mxu1 }
 0x19b   : > { %v1193_v30 = vadd.f32 %v4487_v38, %v1066_v27  ;;  %v1083_v40 = vpop.f32.mrf.mxu0 }
 0x19c   : > { %v1084_v34 = vadd.f32 %v1083_v40, %v951_v44  ;;  %v1186_v25 = vpop.f32.mrf.mxu1 }
 0x19d   : > { %v1187_v1 = vadd.f32 %v1186_v25, %v1060_v17  ;;  %v4500_v11 = vpop.f32.mrf.mxu0 }
 0x19e   : > { %v4490_v56 = vpop.f32.mrf.mxu1  ;;  %v1334_v45 = vadd.f32 %v4500_v11, %v1169_v46 }
 0x19f   : > { %v1205_v52 = vadd.f32 %v4490_v56, %v1078_v19  ;;  %v1323_v26 = vpop.f32.mrf.mxu0 }
 0x1a0   : > { %v1198_v7 = vpop.f32.mrf.mxu1  ;;  %v1324_v57 = vadd.f32 %v1323_v26, %v1163_v43 }
 0x1a1   : > { %v1199_v10 = vadd.f32 %v1198_v7, %v1072_v60  ;;  %v4503_v54 = vpop.f32.mrf.mxu0 }
 0x1a2   : > { %v4493_v39 = vpop.f32.mrf.mxu1  ;;  %v1354_v4 = vadd.f32 %v4503_v54, %v1181_v37 }
 0x1a3   : > { %v1217_v22 = vadd.f32 %v4493_v39, %v1090_v2  ;;  %v1343_v8 = vpop.f32.mrf.mxu0 }
 0x1a4   : > { %v1210_v63 = vpop.f32.mrf.mxu1  ;;  %v1344_v13 = vadd.f32 %v1343_v8, %v1175_v62 }
 0x1a5   : > { %v1211_v50 = vadd.f32 %v1210_v63, %v1084_v34  ;;  %v4506_v49 = vpop.f32.mrf.mxu0 }
 0x1a6   : > { %v1374_v0 = vadd.f32 %v4506_v49, %v1193_v30  ;;  %v4519_v12 = vpop.f32.mrf.mxu1 }
 0x1a7   : > { %v1501_v41 = vadd.f32 %v4519_v12, %v1334_v45  ;;  %v1363_v3 = vpop.f32.mrf.mxu0 }
 0x1a8   : > { %v1364_v16 = vadd.f32 %v1363_v3, %v1187_v1  ;;  %v1494_v20 = vpop.f32.mrf.mxu1 }
 0x1a9   : > { %v1495_v14 = vadd.f32 %v1494_v20, %v1324_v57  ;;  %v4509_v36 = vpop.f32.mrf.mxu0 }
 0x1aa   : > { %v1394_v28 = vadd.f32 %v4509_v36, %v1205_v52  ;;  %v4522_v21 = vpop.f32.mrf.mxu1 }
 0x1ab   : > { %v1513_v42 = vadd.f32 %v4522_v21, %v1354_v4  ;;  %v1383_v61 = vpop.f32.mrf.mxu0 }
 0x1ac   : > { %v1384_v53 = vadd.f32 %v1383_v61, %v1199_v10  ;;  %v1506_v35 = vpop.f32.mrf.mxu1 }
 0x1ad   : > { %v1507_v9 = vadd.f32 %v1506_v35, %v1344_v13  ;;  %v4512_v24 = vpop.f32.mrf.mxu0 }
 0x1ae   : > { %v1414_v15 = vadd.f32 %v4512_v24, %v1217_v22  ;;  %v4525_v47 = vpop.f32.mrf.mxu1 }
 0x1af   : > { %v1525_v48 = vadd.f32 %v4525_v47, %v1374_v0  ;;  %v1403_v59 = vpop.f32.mrf.mxu0 }
 0x1b0   : > { %v1404_v51 = vadd.f32 %v1403_v59, %v1211_v50  ;;  %v1518_v31 = vpop.f32.mrf.mxu1 }
 0x1b1   : > { %v1519_v44 = vadd.f32 %v1518_v31, %v1364_v16  ;;  %v4538_v55 = vpop.f32.mrf.mxu0 }
 0x1b2   : > { %v4528_v27 = vpop.f32.mrf.mxu1  ;;  %v1632_v5 = vadd.f32 %v4538_v55, %v1501_v41 }
 0x1b3   : > { %v1537_v46 = vadd.f32 %v4528_v27, %v1394_v28  ;;  %v1624_v6 = vpop.f32.mrf.mxu0 }
 0x1b4   : > { %v1530_v17 = vpop.f32.mrf.mxu1  ;;  %v1625_v29 = vadd.f32 %v1624_v6, %v1495_v14 }
 0x1b5   : > { %v1531_v43 = vadd.f32 %v1530_v17, %v1384_v53  ;;  %v4541_v23 = vpop.f32.mrf.mxu0 }
 0x1b6   : > { %v4531_v19 = vpop.f32.mrf.mxu1  ;;  %v1646_v33 = vadd.f32 %v4541_v23, %v1513_v42 }
 0x1b7   : > { %v1549_v37 = vadd.f32 %v4531_v19, %v1414_v15  ;;  %v1638_v58 = vpop.f32.mrf.mxu0 }
 0x1b8   : > { %v1542_v60 = vpop.f32.mrf.mxu1  ;;  %v1639_v32 = vadd.f32 %v1638_v58, %v1507_v9 }
 0x1b9   : > { %v1543_v62 = vadd.f32 %v1542_v60, %v1404_v51  ;;  %v4544_v18 = vpop.f32.mrf.mxu0 }
 0x1ba   : > { %v1660_v2 = vadd.f32 %v4544_v18, %v1525_v48  ;;  %v4557_v38 = vpop.f32.mrf.mxu1 }
 0x1bb   : > { %v1771_v30 = vadd.f32 %v4557_v38, %v1632_v5  ;;  %v1652_v40 = vpop.f32.mrf.mxu0 }
 0x1bc   : > { %v1653_v34 = vadd.f32 %v1652_v40, %v1519_v44  ;;  %v1762_v25 = vpop.f32.mrf.mxu1 }
 0x1bd   : > { %v1763_v1 = vadd.f32 %v1762_v25, %v1625_v29  ;;  %v4547_v11 = vpop.f32.mrf.mxu0 }
 0x1be   : > { %v1674_v56 = vadd.f32 %v4547_v11, %v1537_v46  ;;  %v4560_v45 = vpop.f32.mrf.mxu1 }
 0x1bf   : > { %v1787_v52 = vadd.f32 %v4560_v45, %v1646_v33  ;;  %v1666_v26 = vpop.f32.mrf.mxu0 }
 0x1c0   : > { %v1667_v7 = vadd.f32 %v1666_v26, %v1531_v43  ;;  %v1778_v57 = vpop.f32.mrf.mxu1 }
 0x1c1   : > { %v1779_v10 = vadd.f32 %v1778_v57, %v1639_v32  ;;  %v4550_v54 = vpop.f32.mrf.mxu0 }
 0x1c2   : > { %v1688_v39 = vadd.f32 %v4550_v54, %v1549_v37  ;;  %v4563_v4 = vpop.f32.mrf.mxu1 }
 0x1c3   : > { %v1803_v22 = vadd.f32 %v4563_v4, %v1660_v2  ;;  %v1680_v8 = vpop.f32.mrf.mxu0 }
 0x1c4   : > { %v1681_v63 = vadd.f32 %v1680_v8, %v1543_v62  ;;  %v1794_v13 = vpop.f32.mrf.mxu1 }
 0x1c5   : > { %v1795_v50 = vadd.f32 %v1794_v13, %v1653_v34  ;;  %v4576_v49 = vpop.f32.mrf.mxu0 }
 0x1c6   : > { %v4566_v0 = vpop.f32.mrf.mxu1  ;;  %v1918_v12 = vadd.f32 %v4576_v49, %v1771_v30 }
 0x1c7   : > { %v1819_v41 = vadd.f32 %v4566_v0, %v1674_v56  ;;  %v1911_v3 = vpop.f32.mrf.mxu0 }
 0x1c8   : > { %v1810_v16 = vpop.f32.mrf.mxu1  ;;  %v1912_v20 = vadd.f32 %v1911_v3, %v1763_v1 }
 0x1c9   : > { %v1811_v14 = vadd.f32 %v1810_v16, %v1667_v7  ;;  %v4579_v36 = vpop.f32.mrf.mxu0 }
 0x1ca   : > { %v4569_v28 = vpop.f32.mrf.mxu1  ;;  %v1930_v21 = vadd.f32 %v4579_v36, %v1787_v52 }
 0x1cb   : > { %v1835_v42 = vadd.f32 %v4569_v28, %v1688_v39  ;;  %v1923_v61 = vpop.f32.mrf.mxu0 }
 0x1cc   : > { %v1826_v53 = vpop.f32.mrf.mxu1  ;;  %v1924_v35 = vadd.f32 %v1923_v61, %v1779_v10 }
 0x1cd   : > { %v1827_v9 = vadd.f32 %v1826_v53, %v1681_v63  ;;  %v4582_v24 = vpop.f32.mrf.mxu0 }
 0x1ce   : > { %v1942_v15 = vadd.f32 %v4582_v24, %v1803_v22  ;;  %v4595_v47 = vpop.f32.mrf.mxu1 }
 0x1cf   : > { %v5930_v48 = vadd.f32 %v4595_v47, %v1918_v12  ;;  %v1935_v59 = vpop.f32.mrf.mxu0 }
 0x1d0   : > { %v1936_v51 = vadd.f32 %v1935_v59, %v1795_v50  ;;  %v2038_v31 = vpop.f32.mrf.mxu1 }
 0x1d1   : > { %v5932_v44 = vadd.f32 %v2038_v31, %v1912_v20  ;;  %v4585_v55 = vpop.f32.mrf.mxu0 }
 0x1d2   : > { %v1954_v27 = vadd.f32 %v4585_v55, %v1819_v41  ;;  %v4598_v5 = vpop.f32.mrf.mxu1 }
 0x1d3   : > { %v5934_v46 = vadd.f32 %v4598_v5, %v1930_v21  ;;  %v1947_v6 = vpop.f32.mrf.mxu0 }
 0x1d4   : > { %v1948_v17 = vadd.f32 %v1947_v6, %v1811_v14  ;;  %v2050_v29 = vpop.f32.mrf.mxu1 }
 0x1d5   : > { %v5936_v43 = vadd.f32 %v2050_v29, %v1924_v35  ;;  %v4588_v23 = vpop.f32.mrf.mxu0 }
 0x1d6   : > { %v1966_v19 = vadd.f32 %v4588_v23, %v1835_v42  ;;  %v4601_v33 = vpop.f32.mrf.mxu1 }
 0x1d7   : > { %v5938_v37 = vadd.f32 %v4601_v33, %v1942_v15  ;;  %v1959_v58 = vpop.f32.mrf.mxu0 }
 0x1d8   : > { %v1960_v60 = vadd.f32 %v1959_v58, %v1827_v9  ;;  %v2062_v32 = vpop.f32.mrf.mxu1 }
 0x1d9   : > { %v5940_v62 = vadd.f32 %v2062_v32, %v1936_v51  ;;  %v4614_v18 = vpop.f32.mrf.mxu0 }
 0x1da   : > { %v4604_v2 = vpop.f32.mrf.mxu1 }
 0x1db   : > { %v5942_v38 = vadd.f32 %v4604_v2, %v1954_v27  ;;  %v2223_v30 = vpop.f32.mrf.mxu0 }
 0x1dc   : > { %v2074_v40 = vpop.f32.mrf.mxu1 }
 0x1dd   : > { %v5944_v34 = vadd.f32 %v2074_v40, %v1948_v17  ;;  %v4617_v25 = vpop.f32.mrf.mxu0 }
 0x1de   : > { %v4607_v1 = vpop.f32.mrf.mxu1 }
 0x1df   : > { %v5946_v11 = vadd.f32 %v4607_v1, %v1966_v19  ;;  %v2243_v56 = vpop.f32.mrf.mxu0 }
 0x1e0   : > { %v2086_v45 = vpop.f32.mrf.mxu1 }
 0x1e1   : > { %v5948_v52 = vadd.f32 %v2086_v45, %v1960_v60  ;;  %v4620_v26 = vpop.f32.mrf.mxu0 }
 0x1e2   : > { %v4633_v7 = vpop.f32.mrf.mxu1 }
 0x1e3   : > { %v2401_v57 = vadd.f32 %v4633_v7, %v4614_v18  ;;  %v2263_v10 = vpop.f32.mrf.mxu0 }
 0x1e4   : > { %v2394_v54 = vpop.f32.mrf.mxu1 }
 0x1e5   : > { %v2395_v39 = vadd.f32 %v2394_v54, %v2223_v30  ;;  %v4623_v4 = vpop.f32.mrf.mxu0 }
 0x1e6   : > { %v4636_v22 = vpop.f32.mrf.mxu1 }
 0x1e7   : > { %v2413_v8 = vadd.f32 %v4636_v22, %v4617_v25  ;;  %v2283_v63 = vpop.f32.mrf.mxu0 }
 0x1e8   : > { %v2406_v13 = vpop.f32.mrf.mxu1 }
 0x1e9   : > { %v2407_v50 = vadd.f32 %v2406_v13, %v2243_v56  ;;  %v4626_v49 = vpop.f32.mrf.mxu0 }
 0x1ea   : > { %v4639_v0 = vpop.f32.mrf.mxu1 }
 0x1eb   : > { %v2425_v12 = vadd.f32 %v4639_v0, %v4620_v26  ;;  %v2303_v41 = vpop.f32.mrf.mxu0 }
 0x1ec   : > { %v2418_v3 = vpop.f32.mrf.mxu1 }
 0x1ed   : > { %v2419_v16 = vadd.f32 %v2418_v3, %v2263_v10  ;;  %v4652_v20 = vpop.f32.mrf.mxu0 }
 0x1ee   : > { %v4642_v14 = vpop.f32.mrf.mxu1  ;;  %v2532_v36 = vadd.f32 %v4652_v20, %v2401_v57 }
 0x1ef   : > { %v2437_v28 = vadd.f32 %v4642_v14, %v4623_v4  ;;  %v2524_v21 = vpop.f32.mrf.mxu0 }
 0x1f0   : > { %v2430_v42 = vpop.f32.mrf.mxu1  ;;  %v2525_v61 = vadd.f32 %v2524_v21, %v2395_v39 }
 0x1f1   : > { %v2431_v53 = vadd.f32 %v2430_v42, %v2283_v63  ;;  %v4655_v35 = vpop.f32.mrf.mxu0 }
 0x1f2   : > { %v4645_v9 = vpop.f32.mrf.mxu1  ;;  %v2546_v24 = vadd.f32 %v4655_v35, %v2413_v8 }
 0x1f3   : > { %v2449_v15 = vadd.f32 %v4645_v9, %v4626_v49  ;;  %v2538_v47 = vpop.f32.mrf.mxu0 }
 0x1f4   : > { %v2442_v59 = vpop.f32.mrf.mxu1  ;;  %v2539_v51 = vadd.f32 %v2538_v47, %v2407_v50 }
 0x1f5   : > { %v2443_v31 = vadd.f32 %v2442_v59, %v2303_v41  ;;  %v4658_v55 = vpop.f32.mrf.mxu0 }
 0x1f6   : > { %v2560_v27 = vadd.f32 %v4658_v55, %v2425_v12  ;;  %v4671_v5 = vpop.f32.mrf.mxu1 }
 0x1f7   : > { %v2671_v6 = vadd.f32 %v4671_v5, %v2532_v36  ;;  %v2552_v17 = vpop.f32.mrf.mxu0 }
 0x1f8   : > { %v2553_v29 = vadd.f32 %v2552_v17, %v2419_v16  ;;  %v2662_v23 = vpop.f32.mrf.mxu1 }
 0x1f9   : > { %v2663_v19 = vadd.f32 %v2662_v23, %v2525_v61  ;;  %v4661_v33 = vpop.f32.mrf.mxu0 }
 0x1fa   : > { %v2574_v58 = vadd.f32 %v4661_v33, %v2437_v28  ;;  %v4674_v60 = vpop.f32.mrf.mxu1 }
 0x1fb   : > { %v2687_v32 = vadd.f32 %v4674_v60, %v2546_v24  ;;  %v2566_v18 = vpop.f32.mrf.mxu0 }
 0x1fc   : > { %v2567_v2 = vadd.f32 %v2566_v18, %v2431_v53  ;;  %v2678_v30 = vpop.f32.mrf.mxu1 }
 0x1fd   : > { %v2679_v40 = vadd.f32 %v2678_v30, %v2539_v51  ;;  %v4664_v25 = vpop.f32.mrf.mxu0 }
 0x1fe   : > { %v2588_v1 = vadd.f32 %v4664_v25, %v2449_v15  ;;  %v4677_v56 = vpop.f32.mrf.mxu1 }
 0x1ff   : > { %v2703_v45 = vadd.f32 %v4677_v56, %v2560_v27  ;;  %v2580_v26 = vpop.f32.mrf.mxu0 }
 0x200   : > { %v2581_v7 = vadd.f32 %v2580_v26, %v2443_v31  ;;  %v2694_v57 = vpop.f32.mrf.mxu1 }
 0x201   : > { %v2695_v10 = vadd.f32 %v2694_v57, %v2553_v29  ;;  %v4690_v54 = vpop.f32.mrf.mxu0 }
 0x202   : > { %v4680_v39 = vpop.f32.mrf.mxu1  ;;  %v2818_v4 = vadd.f32 %v4690_v54, %v2671_v6 }
 0x203   : > { %v2719_v22 = vadd.f32 %v4680_v39, %v2574_v58  ;;  %v2811_v8 = vpop.f32.mrf.mxu0 }
 0x204   : > { %v2710_v63 = vpop.f32.mrf.mxu1  ;;  %v2812_v13 = vadd.f32 %v2811_v8, %v2663_v19 }
 0x205   : > { %v2711_v50 = vadd.f32 %v2710_v63, %v2567_v2  ;;  %v4693_v49 = vpop.f32.mrf.mxu0 }
 0x206   : > { %v4683_v0 = vpop.f32.mrf.mxu1  ;;  %v2830_v12 = vadd.f32 %v4693_v49, %v2687_v32 }
 0x207   : > { %v2735_v41 = vadd.f32 %v4683_v0, %v2588_v1  ;;  %v2823_v3 = vpop.f32.mrf.mxu0 }
 0x208   : > { %v2726_v16 = vpop.f32.mrf.mxu1  ;;  %v2824_v20 = vadd.f32 %v2823_v3, %v2679_v40 }
 0x209   : > { %v2727_v14 = vadd.f32 %v2726_v16, %v2581_v7  ;;  %v4696_v36 = vpop.f32.mrf.mxu0 }
 0x20a   : > { %v4709_v28 = vpop.f32.mrf.mxu1  ;;  %v2842_v55 = vadd.f32 %v4696_v36, %v2703_v45 }
 0x20b   : > { %v2945_v21 = vadd.f32 %v4709_v28, %v2818_v4  ;;  %v2835_v42 = vpop.f32.mrf.mxu0 }
 0x20c   : > { %v2836_v61 = vadd.f32 %v2835_v42, %v2695_v10  ;;  %v2938_v53 = vpop.f32.mrf.mxu1 }
 0x20d   : > { %v5951_v35 = vadd.f32 %v2945_v21, %v5930_v48  ;;  %v2939_v9 = vadd.f32 %v2938_v53, %v2812_v13  ;;  %v4699_v24 = vpop.f32.mrf.mxu0 }
 0x20e   : > { %v4712_v15 = vpop.f32.mrf.mxu1  ;;  %v2854_v33 = vadd.f32 %v4699_v24, %v2719_v22 }
 0x20f   : > { %v5954_v47 = vadd.f32 %v2939_v9, %v5932_v44  ;;  %v2957_v59 = vadd.f32 %v4712_v15, %v2830_v12  ;;  %v2847_v51 = vpop.f32.mrf.mxu0 }
 0x210   : > { %v2950_v31 = vpop.f32.mrf.mxu1  ;;  %v2848_v18 = vadd.f32 %v2847_v51, %v2711_v50 }
 0x211   : > { %v5957_v27 = vadd.f32 %v2957_v59, %v5934_v46  ;;  %v2951_v5 = vadd.f32 %v2950_v31, %v2824_v20  ;;  %v4702_v6 = vpop.f32.mrf.mxu0 }
 0x212   : > { %v4715_v17 = vpop.f32.mrf.mxu1 }
 0x213   : > { %6039 = vst [vmem:[#allocation4_spill] sm:$0xff] %v5957_v27  ;;  %v5960_v29 = vadd.f32 %v2951_v5, %v5936_v43  ;;  %v2969_v48 = vadd.f32 %v4715_v17, %v2842_v55  ;;  %v2859_v23 = vpop.f32.mrf.mxu0  ;;  %v2866_v43 = vadd.f32 %v4702_v6, %v2735_v41 }
 0x214   : > { %v2962_v19 = vpop.f32.mrf.mxu1  ;;  %v2860_v45 = vadd.f32 %v2859_v23, %v2727_v14 }
 0x215   : > { %v5963_v44 = vadd.f32 %v2969_v48, %v5938_v37  ;;  %v2963_v58 = vadd.f32 %v2962_v19, %v2836_v61  ;;  %v5965_v60 = vpop.f32.mrf.mxu0 }
 0x216   : > { %v4718_v32 = vpop.f32.mrf.mxu1 }
 0x217   : > { %v5968_v46 = vadd.f32 %v2963_v58, %v5940_v62  ;;  %v2981_v2 = vadd.f32 %v4718_v32, %v2854_v33  ;;  %v3133_v30 = vpop.f32.mrf.mxu0 }
 0x218   : > { %v2974_v40 = vpop.f32.mrf.mxu1 }
 0x219   : > { %v5971_v25 = vadd.f32 %v2981_v2, %v5942_v38  ;;  %v2975_v1 = vadd.f32 %v2974_v40, %v2848_v18  ;;  %v5973_v56 = vpop.f32.mrf.mxu0 }
 0x21a   : > { %v4721_v37 = vpop.f32.mrf.mxu1 }
 0x21b   : > { %v5976_v26 = vadd.f32 %v2975_v1, %v5944_v34  ;;  %v2993_v7 = vadd.f32 %v4721_v37, %v2866_v43  ;;  %v3153_v57 = vpop.f32.mrf.mxu0 }
 0x21c   : > { %v2986_v10 = vpop.f32.mrf.mxu1 }
 0x21d   : > { %6040 = vst [vmem:[#allocation5_spill] sm:$0xff] %v5976_v26  ;;  %v5979_v62 = vadd.f32 %v2993_v7, %v5946_v11  ;;  %v2987_v54 = vadd.f32 %v2986_v10, %v2860_v45  ;;  %v4734_v39 = vpop.f32.mrf.mxu0 }
 0x21e   : > { %v4747_v4 = vpop.f32.mrf.mxu1 }
 0x21f   : > { %6041 = vst [vmem:[#allocation6_spill] sm:$0xff] %v5979_v62  ;;  %v5982_v38 = vadd.f32 %v2987_v54, %v5948_v52  ;;  %v3173_v22 = vpop.f32.mrf.mxu0  ;;  %v3311_v10 = vadd.f32 %v4747_v4, %v5965_v60 }
 0x220   : > { %v3304_v8 = vpop.f32.mrf.mxu1 }
 0x221   : > { %6042 = vst [vmem:[#allocation7_spill] sm:$0xff] %v5982_v38  ;;  %v4737_v63 = vpop.f32.mrf.mxu0  ;;  %v3305_v58 = vadd.f32 %v3304_v8, %v3133_v30 }
 0x222   : > { %v4750_v13 = vpop.f32.mrf.mxu1 }
 0x223   : > { %v3193_v50 = vpop.f32.mrf.mxu0  ;;  %v3323_v8 = vadd.f32 %v4750_v13, %v5973_v56 }
 0x224   : > { %v3316_v49 = vpop.f32.mrf.mxu1 }
 0x225   : > { %v4740_v34 = vpop.f32.mrf.mxu0  ;;  %v3317_v43 = vadd.f32 %v3316_v49, %v3153_v57 }
 0x226   : > { %v4753_v0 = vpop.f32.mrf.mxu1 }
 0x227   : > { %v5984_v12 = vpop.f32.mrf.mxu0  ;;  %v3335_v37 = vadd.f32 %v4753_v0, %v4734_v39 }
 0x228   : > { %v3328_v41 = vpop.f32.mrf.mxu1 }
 0x229   : > { %v4766_v3 = vpop.f32.mrf.mxu0  ;;  %v3329_v57 = vadd.f32 %v3328_v41, %v3173_v22 }
 0x22a   : > { %v4756_v11 = vpop.f32.mrf.mxu1  ;;  %v3442_v26 = vadd.f32 %v4766_v3, %v3311_v10  ;;  %v6043_v10 = vld [vmem:[#allocation5_spill] sm:$0xff] }
 0x22b   : > { %v3434_v16 = vpop.f32.mrf.mxu0  ;;  %v3347_v49 = vadd.f32 %v4756_v11, %v4737_v63 }
 0x22c   : > { %v3340_v20 = vpop.f32.mrf.mxu1  ;;  %v3435_v2 = vadd.f32 %v3434_v16, %v3305_v58 }
 0x22d   : > { %v4769_v14 = vpop.f32.mrf.mxu0 }
 0x22e   : > { %v4759_v36 = vpop.f32.mrf.mxu1  ;;  %v3456_v60 = vadd.f32 %v4769_v14, %v3323_v8 }
 0x22f   : > { %v3448_v28 = vpop.f32.mrf.mxu0 }
 0x230   : > { %v3352_v52 = vpop.f32.mrf.mxu1  ;;  %v3449_v54 = vadd.f32 %v3448_v28, %v3317_v43 }
 0x231   : > { %v4772_v21 = vpop.f32.mrf.mxu0  ;;  %v3353_v13 = vadd.f32 %v3352_v52, %v5984_v12 }
 0x232   : > { %v4785_v42 = vpop.f32.mrf.mxu1  ;;  %v3470_v62 = vadd.f32 %v4772_v21, %v3335_v37  ;;  %v3359_v21 = vadd.f32 %v4759_v36, %v4740_v34 }
 0x233   : > { %v3462_v61 = vpop.f32.mrf.mxu0  ;;  %v3581_v4 = vadd.f32 %v4785_v42, %v3442_v26 }
 0x234   : > { %v3572_v53 = vpop.f32.mrf.mxu1 }
 0x235   : > { %v4775_v9 = vpop.f32.mrf.mxu0  ;;  %v3573_v45 = vadd.f32 %v3572_v53, %v3435_v2  ;;  %v3341_v2 = vadd.f32 %v3340_v20, %v3193_v50 }
 0x236   : > { %v4788_v24 = vpop.f32.mrf.mxu1  ;;  %v3484_v37 = vadd.f32 %v4775_v9, %v3347_v49 }
 0x237   : > { %v3476_v15 = vpop.f32.mrf.mxu0  ;;  %v3597_v11 = vadd.f32 %v4788_v24, %v3456_v60 }
 0x238   : > { %v3588_v59 = vpop.f32.mrf.mxu1  ;;  %v3477_v22 = vadd.f32 %v3476_v15, %v3341_v2 }
 0x239   : > { %v4778_v51 = vpop.f32.mrf.mxu0  ;;  %v3589_v16 = vadd.f32 %v3588_v59, %v3449_v54 }
 0x23a   : > { %v4791_v31 = vpop.f32.mrf.mxu1  ;;  %v3498_v20 = vadd.f32 %v4778_v51, %v3359_v21 }
 0x23b   : > { %v3490_v55 = vpop.f32.mrf.mxu0  ;;  %v3613_v39 = vadd.f32 %v4791_v31, %v3470_v62 }
 0x23c   : > { %v3604_v5 = vpop.f32.mrf.mxu1  ;;  %v3491_v42 = vadd.f32 %v3490_v55, %v3353_v13 }
 0x23d   : > { %v4804_v6 = vpop.f32.mrf.mxu0 }
 0x23e   : > { %v4794_v17 = vpop.f32.mrf.mxu1  ;;  %v3728_v63 = vadd.f32 %v4804_v6, %v3581_v4  ;;  %v6046_v4 = vld [vmem:[#allocation7_spill] sm:$0xff] }
 0x23f   : > { %v3721_v48 = vpop.f32.mrf.mxu0  ;;  %v3629_v50 = vadd.f32 %v4794_v17, %v3484_v37 }
 0x240   : > { %v3620_v23 = vpop.f32.mrf.mxu1  ;;  %v3722_v27 = vadd.f32 %v3721_v48, %v3573_v45  ;;  %v3463_v48 = vadd.f32 %v3462_v61, %v3329_v57 }
 0x241   : > { %v4807_v19 = vpop.f32.mrf.mxu0  ;;  %v3621_v14 = vadd.f32 %v3620_v23, %v3477_v22 }
 0x242   : > { %v4797_v33 = vpop.f32.mrf.mxu1  ;;  %v3740_v15 = vadd.f32 %v4807_v19, %v3597_v11 }
 0x243   : > { %v3733_v32 = vpop.f32.mrf.mxu0  ;;  %v3645_v52 = vadd.f32 %v4797_v33, %v3498_v20 }
 0x244   : > { %v5986_v18 = vpop.f32.mrf.mxu1  ;;  %v3734_v28 = vadd.f32 %v3733_v32, %v3589_v16  ;;  %v6044_v16 = vld [vmem:[#allocation4_spill] sm:$0xff] }
 0x245   : > { %v4810_v40 = vpop.f32.mrf.mxu0  ;;  %v3637_v23 = vadd.f32 %v5986_v18, %v3491_v42 }
 0x246   : > { %v4823_v1 = vpop.f32.mrf.mxu1  ;;  %v3752_v56 = vadd.f32 %v4810_v40, %v3613_v39  ;;  %v6045_v39 = vld [vmem:[#allocation6_spill] sm:$0xff] }
 0x247   : > { %v3745_v7 = vpop.f32.mrf.mxu0  ;;  %v3855_v34 = vadd.f32 %v4823_v1, %v3728_v63 }
 0x248   : > { %v3848_v38 = vpop.f32.mrf.mxu1 }
 0x249   : > { %v4813_v30 = vpop.f32.mrf.mxu0  ;;  %v3849_v0 = vadd.f32 %v3848_v38, %v3722_v27  ;;  %v3605_v38 = vadd.f32 %v3604_v5, %v3463_v48  ;;  %v3907_v32 = vadd.f32 %v3855_v34, %v5951_v35 }
 0x24a   : > { %v4826_v58 = vpop.f32.mrf.mxu1  ;;  %v3764_v9 = vadd.f32 %v4813_v30, %v3629_v50 }
 0x24b   : > { %v3757_v53 = vpop.f32.mrf.mxu0  ;;  %v3906_v26 = vadd.f32 %v3849_v0, %v5954_v47  ;;  %v3746_v61 = vadd.f32 %v3745_v7, %v3605_v38  ;;  %v3867_v55 = vadd.f32 %v4826_v58, %v3740_v15  ;;  %v3917_v8 = vmul.f32 %v3907_v32, %v3907_v32 }
 0x24c   : > { %v3860_v43 = vpop.f32.mrf.mxu1  ;;  %v3758_v59 = vadd.f32 %v3757_v53, %v3621_v14 }
 0x24d   : > { %v3861_v62 = vadd.f32 %v3860_v43, %v3734_v28  ;;  %v4816_v41 = vpop.f32.mrf.mxu0  ;;  %v3916_v47 = vmul.f32 %v3906_v26, %v3906_v26  ;;  %v3909_v58 = vadd.f32 %v3867_v55, %v6044_v16 }
 0x24e   : > { %v4829_v27 = vpop.f32.mrf.mxu1  ;;  %v3776_v19 = vadd.f32 %v4816_v41, %v3645_v52 }
 0x24f   : > { %v3879_v3 = vadd.f32 %v4829_v27, %v3752_v56  ;;  %v3908_v31 = vadd.f32 %v3861_v62, %v5960_v29  ;;  %v3769_v17 = vpop.f32.mrf.mxu0  ;;  %v3919_v43 = vmul.f32 %v3909_v58, %v3909_v58 }
 0x250   : > { %v3872_v36 = vpop.f32.mrf.mxu1  ;;  %v3770_v45 = vadd.f32 %v3769_v17, %v3637_v23 }
 0x251   : > { %v3911_v12 = vadd.f32 %v3879_v3, %v5963_v44  ;;  %v3873_v24 = vadd.f32 %v3872_v36, %v3746_v61  ;;  %v3918_v1 = vmul.f32 %v3908_v31, %v3908_v31 }
 0x252   : > { %v4832_v5 = vpop.f32.mrf.mxu1 }
 0x253   : > { %v3921_v6 = vmul.f32 %v3911_v12, %v3911_v12  ;;  %v3891_v51 = vadd.f32 %v4832_v5, %v3764_v9  ;;  %v3910_v35 = vadd.f32 %v3873_v24, %v5968_v46 }
 0x254   : > { %v3884_v44 = vpop.f32.mrf.mxu1 }
 0x255   : > { %v3926_v29 = vadd.f32 %v3921_v6, %v3916_v47  ;;  %v3913_v33 = vadd.f32 %v3891_v51, %v5971_v25  ;;  %v3885_v40 = vadd.f32 %v3884_v44, %v3758_v59  ;;  %v3920_v2 = vmul.f32 %v3910_v35, %v3910_v35 }
 0x256   : > { %v4835_v7 = vpop.f32.mrf.mxu1 }
 0x257   : > { %3931 = vst [vmem:[%s6006_s20] sm:$0xff] %v3926_v29  ;;  %v3923_v18 = vmul.f32 %v3913_v33, %v3913_v33  ;;  %v3912_v54 = vadd.f32 %v3885_v40, %v6043_v10  ;;  %v3903_v30 = vadd.f32 %v4835_v7, %v3776_v19 }
 0x258   : > { %v3896_v57 = vpop.f32.mrf.mxu1 }
 0x259   : > { %v3928_v25 = vadd.f32 %v3923_v18, %v3918_v1  ;;  %v3922_v49 = vmul.f32 %v3912_v54, %v3912_v54  ;;  %v3915_v0 = vadd.f32 %v3903_v30, %v6045_v39  ;;  %v3897_v53 = vadd.f32 %v3896_v57, %v3770_v45 }
 0x25b   : > { %3933 = vst [vmem:[%s6006_s20 + $0x10] sm:$0xff] %v3928_v25  ;;  %v3927_v60 = vadd.f32 %v3922_v49, %v3917_v8  ;;  %v3925_v46 = vmul.f32 %v3915_v0, %v3915_v0  ;;  %v3914_v28 = vadd.f32 %v3897_v53, %v6046_v4 }
 0x25d   : > { %3932 = vst [vmem:[%s6006_s20 + $0x8] sm:$0xff] %v3927_v60  ;;  %v3930_v21 = vadd.f32 %v3925_v46, %v3920_v2  ;;  %v3924_v48 = vmul.f32 %v3914_v28, %v3914_v28 }
 0x25f   : > { %3935 = vst [vmem:[%s6006_s20 + $0x20] sm:$0x1] %v3930_v21  ;;  %v3929_v37 = vadd.f32 %v3924_v48, %v3919_v43 }
 0x261   : > { %3934 = vst [vmem:[%s6006_s20 + $0x18] sm:$0xff] %v3929_v37 }
 0x262 PF: > { %s13_s16 = sadd.s32 1, %s4918_s16   ;;  %s6047_s12 = smov %s4906_s13 }
 0x263   : > { %p10_p10 = scmp.ge.s32.totalorder %s13_s16, 6   ;;  %s6048_s13 = smov %s4982_s21 }
 0x264   : > { %s6049_s14 = smov %s4914_s15  ;;  %s6050_s15 = smov %s6052_s17 }
 0x265   :  { %12 = sbr.rel (!%p10_p10) target bundleno = 3 (0x3), region = 154 }

</bundles_post_ra>
